<compile_context>
chip_gen: v6e
topology: v6e:2x2x1
jax: 0.10.0
libtpu: 0.0.40
codegen_flags: <defaults>
</compile_context>

<pallas_src>
import functools

import jax
import jax.numpy as jnp
from jax import lax
from jax.experimental import pallas as pl
from jax.experimental.pallas import tpu as pltpu


# -----------------------------------------------------------------------------
# Pallas kernel: whole BUDDY forward for one batch tile (batch kept in lanes).
# -----------------------------------------------------------------------------
def buddy_kernel(
    sf_ref,    # [TB, DIM]    subgraph features (batch-major, streamed)
    nf_ref,    # [TB, 2F]     node features flattened [src | dst] (streamed)
    wl_ref,    # [DIM, DIM]   label_lin^T, BN folded (output-major)
    bl_ref,    # [DIM, 1]     label bias (BN folded), f32
    wfb_ref,   # [2H, 2F]     block-diag (lin_feat^T | lin_feat^T)
    bfb_ref,   # [2H, 1]      [bf^T ; bf^T], f32
    wo_ref,    # [H, H]       lin_out^T, BN folded, f32
    bo_ref,    # [H, 1]       lin_out bias (BN folded), f32
    wfl_ref,   # [DIM, 1]     final lin weight, label slice, f32
    wff_ref,   # [H, 1]       final lin weight, feature slice, f32
    bfin_ref,  # [1, 1]       final lin bias, f32
    out_ref,   # [1, TB]      lane-dense scores
    *,
    hidden,
):
    f32 = jnp.float32
    # Contract the last dim of both operands -> result [out_dim, TB]
    # (batch lands in the lane dimension; no wrapper-side transpose needed).
    dn = (((1,), (1,)), ((), ()))

    # ---- label branch: relu(bn(label_lin(sf))) (BN folded, dropout=id) ----
    x = lax.dot_general(wl_ref[...], sf_ref[...], dn, preferred_element_type=f32)
    x = jnp.maximum(x + bl_ref[...], 0.0)                  # [DIM, TB]

    # ---- feature branch: fused src/dst lin_feat, hadamard, lin_out, bn, relu
    zf = lax.dot_general(wfb_ref[...], nf_ref[...], dn, preferred_element_type=f32)
    zf = zf + bfb_ref[...]                                  # [2H, TB]
    h = zf[:hidden, :] * zf[hidden:, :]                     # [H, TB] (f32)
    h = jnp.dot(wo_ref[...], h, preferred_element_type=f32) + bo_ref[...]
    h = jnp.maximum(h, 0.0)                                 # [H, TB]

    # ---- final linear as two partial sublane reductions (no concat temp) ----
    score = (jnp.sum(wfl_ref[...] * x, axis=0, keepdims=True)
             + jnp.sum(wff_ref[...] * h, axis=0, keepdims=True)
             + bfin_ref[...])
    out_ref[...] = score                                    # lane-dense store


# -----------------------------------------------------------------------------
# Tile / grid selection
# -----------------------------------------------------------------------------
def _round_up(x, m):
    return ((x + m - 1) // m) * m


def _tensorcores_per_chip():
    """Best-effort detection of TensorCores per chip (v7x has 2)."""
    try:
        n = getattr(jax.devices()[0], "num_cores", 1)
        return max(1, int(n)) if n else 1
    except Exception:
        return 1


def _choose_tile_b(batch, num_cores, max_tile=4096):
    """Largest tile <= max_tile rows, grid a multiple of num_cores."""
    n_tiles = max(num_cores, -(-batch // max_tile))
    n_tiles = _round_up(n_tiles, num_cores)
    return max(128, _round_up(-(-batch // n_tiles), 128))


# -----------------------------------------------------------------------------
# Wrapper
# -----------------------------------------------------------------------------
def buddy_forward(sf, node_features, params, *, tile_b=None,
                  compute_dtype=jnp.float32):
    """sf: [B, DIM] f32, node_features: [B, 2, F] f32 -> [B, 1] f32."""
    B, dim = sf.shape
    F = node_features.shape[-1]
    H = params["wf"].shape[1]

    # ---- fold BatchNorm (eval) into the preceding linears (tiny pre-proc) ----
    wl = params["wl"] * params["bn_l_scale"]                        # [dim, dim]
    bl = params["bl"] * params["bn_l_scale"] + params["bn_l_bias"]  # [1, dim]
    wo = params["wo"] * params["bn_f_scale"]                        # [H, H]
    bo = params["bo"] * params["bn_f_scale"] + params["bn_f_bias"]  # [1, H]
    wf, bf = params["wf"], params["bf"]

    # ---- output-major weights (batch stays in lanes inside the kernel) ----
    wl_t = wl.T.astype(compute_dtype)                               # [dim, dim]
    bl_t = bl.T                                                     # [dim, 1]
    wfb = jnp.zeros((2 * H, 2 * F), jnp.float32)
    wfb = wfb.at[:H, :F].set(wf.T)
    wfb = wfb.at[H:, F:].set(wf.T)
    wfb = wfb.astype(compute_dtype)                                 # [2H, 2F]
    bfb = jnp.concatenate([bf.T, bf.T], axis=0)                     # [2H, 1]
    wo_t = wo.T                                                     # [H, H] f32
    bo_t = bo.T                                                     # [H, 1]
    wfl = params["wlin_lab"]                                        # [dim, 1]
    wff = params["wlin_feat"]                                       # [H, 1]
    bfin = params["blin"]                                           # [1, 1]

    # ---- batch-major inputs, no concat/transpose HBM pass ----
    nf2 = node_features.reshape(B, 2 * F)       # contiguous view-style reshape
    sf_in = sf.astype(compute_dtype)            # no-op for f32
    nf_in = nf2.astype(compute_dtype)

    num_cores = _tensorcores_per_chip()
    if tile_b is not None:
        tb = max(128, _round_up(min(tile_b, B), 128))
    else:
        tb = _choose_tile_b(B, num_cores)
    b_pad = pl.cdiv(B, tb) * tb
    if b_pad != B:
        sf_in = jnp.pad(sf_in, ((0, b_pad - B), (0, 0)))
        nf_in = jnp.pad(nf_in, ((0, b_pad - B), (0, 0)))
    grid = (b_pad // tb,)

    def full(shape):
        return pl.BlockSpec(shape, lambda i: (0, 0))

    in_specs = [
        pl.BlockSpec((tb, dim), lambda i: (i, 0)),      # sf tile (contiguous DMA)
        pl.BlockSpec((tb, 2 * F), lambda i: (i, 0)),    # node-feature tile
        full((dim, dim)), full((dim, 1)),               # label_lin (BN folded)
        full((2 * H, 2 * F)), full((2 * H, 1)),         # fused lin_feat
        full((H, H)), full((H, 1)),                     # lin_out (BN folded)
        full((dim, 1)), full((H, 1)), full((1, 1)),     # final lin
    ]
    out_spec = pl.BlockSpec((1, tb), lambda i: (0, i))  # lane-dense output

    itemsize = jnp.dtype(compute_dtype).itemsize
    weight_bytes = 4 * (dim * dim + dim + 4 * H * F + 2 * H + H * H + H
                        + dim + H + 1)
    cost = pl.CostEstimate(
        flops=2 * b_pad * (dim * dim + 4 * H * F + H * H + dim + H),
        transcendentals=0,
        bytes_accessed=b_pad * (dim + 2 * F) * itemsize + 4 * b_pad
        + weight_bytes,
    )

    out = pl.pallas_call(
        functools.partial(buddy_kernel, hidden=H),
        out_shape=jax.ShapeDtypeStruct((1, b_pad), jnp.float32),
        grid_spec=pl.GridSpec(grid=grid, in_specs=in_specs, out_specs=out_spec),
        compiler_params=pltpu.CompilerParams(
            dimension_semantics=("parallel",)),
        cost_estimate=cost,
    )(sf_in, nf_in, wl_t, bl_t, wfb, bfb, wo_t, bo_t, wfl, wff, bfin)

    # Padded columns (B..b_pad) hold bias-only garbage; never consume them.
    return out[0, :B].reshape(B, 1)


# -----------------------------------------------------------------------------
# Plain-JAX reference (for correctness check)
# -----------------------------------------------------------------------------
def buddy_reference(sf, node_features, p):
    x = sf @ p["wl"] + p["bl"]
    x = x * p["bn_l_scale"] + p["bn_l_bias"]
    x = jnp.maximum(x, 0.0)

    nf = node_features @ p["wf"] + p["bf"][None]       # [B, 2, H]
    h = nf[:, 0, :] * nf[:, 1, :]
    h = h @ p["wo"] + p["bo"]
    h = h * p["bn_f_scale"] + p["bn_f_bias"]
    h = jnp.maximum(h, 0.0)

    cat = jnp.concatenate([x, h], axis=1)
    w_full = jnp.concatenate([p["wlin_lab"], p["wlin_feat"]], axis=0)
    return cat @ w_full + p["blin"]


# -----------------------------------------------------------------------------
# Parameter construction (deterministic, synthetic)
# -----------------------------------------------------------------------------
def make_params(key, dim, num_features, hidden):
    ks = jax.random.split(key, 12)

    def fold_bn(gamma, beta, mean, var, eps=1e-5):
        scale = gamma / jnp.sqrt(var + eps)
        bias = beta - mean * scale
        return scale[None, :], bias[None, :]

    g_l = 1.0 + 0.1 * jax.random.normal(ks[0], (dim,), jnp.float32)
    b_l = 0.05 * jax.random.normal(ks[1], (dim,), jnp.float32)
    m_l = 0.1 * jax.random.normal(ks[2], (dim,), jnp.float32)
    v_l = 1.0 + 0.1 * jnp.abs(jax.random.normal(ks[3], (dim,), jnp.float32))
    g_f = 1.0 + 0.1 * jax.random.normal(ks[4], (hidden,), jnp.float32)
    b_f = 0.05 * jax.random.normal(ks[5], (hidden,), jnp.float32)
    m_f = 0.1 * jax.random.normal(ks[6], (hidden,), jnp.float32)
    v_f = 1.0 + 0.1 * jnp.abs(jax.random.normal(ks[7], (hidden,), jnp.float32))

    bn_l_scale, bn_l_bias = fold_bn(g_l, b_l, m_l, v_l)
    bn_f_scale, bn_f_bias = fold_bn(g_f, b_f, m_f, v_f)

    def lin(k, n_in, n_out, scale=0.1):
        kw, kb = jax.random.split(k)
        w = scale * jax.random.normal(kw, (n_in, n_out), jnp.float32)
        b = scale * jax.random.normal(kb, (1, n_out), jnp.float32)
        return w, b

    wl, bl = lin(ks[8], dim, dim)
    wf, bf = lin(ks[9], num_features, hidden)
    wo, bo = lin(ks[10], hidden, hidden)
    w_final, blin = lin(ks[11], dim + hidden, 1)

    return dict(
        wl=wl, bl=bl, bn_l_scale=bn_l_scale, bn_l_bias=bn_l_bias,
        wf=wf, bf=bf, wo=wo, bo=bo,
        bn_f_scale=bn_f_scale, bn_f_bias=bn_f_bias,
        wlin_lab=w_final[:dim, :], wlin_feat=w_final[dim:, :], blin=blin,
    )


if __name__ == "__main__":
    # max_hash_hops=2 -> dim=8, num_features=16, hidden_channels=32
    B, DIM, F, H = 1024, 8, 16, 32

    key = jax.random.PRNGKey(0)
    k_sf, k_nf, k_par = jax.random.split(key, 3)

    sf = jax.random.normal(k_sf, (B, DIM), jnp.float32)
    node_features = jax.random.normal(k_nf, (B, 2, F), jnp.float32)
    params = make_params(k_par, DIM, F, H)

    ref = buddy_reference(sf, node_features, params)

    # f32 path; tile/grid auto-chosen (grid=1 on single-TC, even >=2 on v7x).
    out = buddy_forward(sf, node_features, params, compute_dtype=jnp.float32)
    out = jax.block_until_ready(out)
    assert out.shape == (B, 1)
    assert jnp.allclose(out, ref, atol=1e-4, rtol=1e-4), (
        f"f32 max abs diff = {jnp.max(jnp.abs(out - ref))}"
    )

    # bf16 streamed operands (first layer only; rest stays f32) -- halves
    # input HBM traffic, useful on every generation incl. v5e.
    out_bf16 = buddy_forward(sf, node_features, params,
                             compute_dtype=jnp.bfloat16)
    out_bf16 = jax.block_until_ready(out_bf16)
    assert jnp.allclose(out_bf16, ref, atol=5e-2, rtol=5e-2), (
        f"bf16 max abs diff = {jnp.max(jnp.abs(out_bf16 - ref))}"
    )

    # Explicit multi-tile path (exercises the parallel grid / padding logic).
    out_tiled = buddy_forward(sf, node_features, params, tile_b=256,
                              compute_dtype=jnp.float32)
    out_tiled = jax.block_until_ready(out_tiled)
    assert jnp.allclose(out_tiled, ref, atol=1e-4, rtol=1e-4), (
        f"tiled max abs diff = {jnp.max(jnp.abs(out_tiled - ref))}"
    )

    print("KERNEL_OK")
</pallas_src>

<mosaic_0001>
module attributes {stable_mosaic.version = 11 : i64} {
  func.func @buddy_kernel(%arg0: i32, %arg1: memref<1024x8xf32, #tpu.memory_space<vmem>>, %arg2: memref<1024x32xf32, #tpu.memory_space<vmem>>, %arg3: memref<8x8xf32, #tpu.memory_space<vmem>>, %arg4: memref<8x1xf32, #tpu.memory_space<vmem>>, %arg5: memref<64x32xf32, #tpu.memory_space<vmem>>, %arg6: memref<64x1xf32, #tpu.memory_space<vmem>>, %arg7: memref<32x32xf32, #tpu.memory_space<vmem>>, %arg8: memref<32x1xf32, #tpu.memory_space<vmem>>, %arg9: memref<8x1xf32, #tpu.memory_space<vmem>>, %arg10: memref<32x1xf32, #tpu.memory_space<vmem>>, %arg11: memref<1x1xf32, #tpu.memory_space<vmem>>, %arg12: memref<1x1024xf32, #tpu.memory_space<vmem>>) attributes {dimension_semantics = [#tpu.dimension_semantics<parallel>], iteration_bounds = array<i64: 1>, scalar_prefetch = 0 : i64, scratch_operands = 0 : i64, tpu.core_type = #tpu.core_type<tc>, window_params = [{transform_indices = @transform_0, window_bounds = array<i64: 1024, 8>}, {transform_indices = @transform_1, window_bounds = array<i64: 1024, 32>}, {pipeline_mode = #tpu.pipeline_mode<synchronous>, transform_indices = @transform_2, window_bounds = array<i64: 8, 8>}, {pipeline_mode = #tpu.pipeline_mode<synchronous>, transform_indices = @transform_3, window_bounds = array<i64: 8, 1>}, {pipeline_mode = #tpu.pipeline_mode<synchronous>, transform_indices = @transform_4, window_bounds = array<i64: 64, 32>}, {pipeline_mode = #tpu.pipeline_mode<synchronous>, transform_indices = @transform_5, window_bounds = array<i64: 64, 1>}, {pipeline_mode = #tpu.pipeline_mode<synchronous>, transform_indices = @transform_6, window_bounds = array<i64: 32, 32>}, {pipeline_mode = #tpu.pipeline_mode<synchronous>, transform_indices = @transform_7, window_bounds = array<i64: 32, 1>}, {pipeline_mode = #tpu.pipeline_mode<synchronous>, transform_indices = @transform_8, window_bounds = array<i64: 8, 1>}, {pipeline_mode = #tpu.pipeline_mode<synchronous>, transform_indices = @transform_9, window_bounds = array<i64: 32, 1>}, {pipeline_mode = #tpu.pipeline_mode<synchronous>, transform_indices = @transform_10, window_bounds = array<i64: 1, 1>}, {transform_indices = @transform_11, window_bounds = array<i64: 1, 1024>}]} {
    %c0 = arith.constant 0 : index
    %c0_0 = arith.constant 0 : index
    %0 = vector.load %arg3[%c0, %c0_0] : memref<8x8xf32, #tpu.memory_space<vmem>>, vector<8x8xf32>
    %c0_1 = arith.constant 0 : index
    %c0_2 = arith.constant 0 : index
    %1 = vector.load %arg1[%c0_1, %c0_2] : memref<1024x8xf32, #tpu.memory_space<vmem>>, vector<1024x8xf32>
    %cst = arith.constant dense<0.000000e+00> : vector<8x1024xf32>
    %2 = tpu.matmul %0, %1, %cst {dimension_numbers = #tpu.dot_dimension_numbers<[1], [1], [0], [0], [0, 0, 1, 0], [], []>} : vector<8x8xf32>, vector<1024x8xf32>, vector<8x1024xf32> -> vector<8x1024xf32>
    %c0_3 = arith.constant 0 : index
    %c0_4 = arith.constant 0 : index
    %3 = vector.load %arg4[%c0_3, %c0_4] : memref<8x1xf32, #tpu.memory_space<vmem>>, vector<8x1xf32>
    %4 = vector.broadcast %3 : vector<8x1xf32> to vector<8x1024xf32>
    %5 = arith.addf %2, %4 : vector<8x1024xf32>
    %cst_5 = arith.constant 0.000000e+00 : f32
    %6 = vector.broadcast %cst_5 : f32 to vector<8x1024xf32>
    %7 = arith.maximumf %5, %6 : vector<8x1024xf32>
    %c0_6 = arith.constant 0 : index
    %c0_7 = arith.constant 0 : index
    %8 = vector.load %arg5[%c0_6, %c0_7] : memref<64x32xf32, #tpu.memory_space<vmem>>, vector<64x32xf32>
    %c0_8 = arith.constant 0 : index
    %c0_9 = arith.constant 0 : index
    %9 = vector.load %arg2[%c0_8, %c0_9] : memref<1024x32xf32, #tpu.memory_space<vmem>>, vector<1024x32xf32>
    %cst_10 = arith.constant dense<0.000000e+00> : vector<64x1024xf32>
    %10 = tpu.matmul %8, %9, %cst_10 {dimension_numbers = #tpu.dot_dimension_numbers<[1], [1], [0], [0], [0, 0, 1, 0], [], []>} : vector<64x32xf32>, vector<1024x32xf32>, vector<64x1024xf32> -> vector<64x1024xf32>
    %c0_11 = arith.constant 0 : index
    %c0_12 = arith.constant 0 : index
    %11 = vector.load %arg6[%c0_11, %c0_12] : memref<64x1xf32, #tpu.memory_space<vmem>>, vector<64x1xf32>
    %12 = vector.broadcast %11 : vector<64x1xf32> to vector<64x1024xf32>
    %13 = arith.addf %10, %12 : vector<64x1024xf32>
    %14 = vector.extract_strided_slice %13 {offsets = [0, 0], sizes = [32, 1024], strides = [1, 1]} : vector<64x1024xf32> to vector<32x1024xf32>
    %15 = vector.extract_strided_slice %13 {offsets = [32, 0], sizes = [32, 1024], strides = [1, 1]} : vector<64x1024xf32> to vector<32x1024xf32>
    %16 = arith.mulf %14, %15 : vector<32x1024xf32>
    %c0_13 = arith.constant 0 : index
    %c0_14 = arith.constant 0 : index
    %17 = vector.load %arg7[%c0_13, %c0_14] : memref<32x32xf32, #tpu.memory_space<vmem>>, vector<32x32xf32>
    %cst_15 = arith.constant dense<0.000000e+00> : vector<32x1024xf32>
    %18 = tpu.matmul %17, %16, %cst_15 {dimension_numbers = #tpu.dot_dimension_numbers<[1], [0], [0], [1], [0, 0, 1, 1], [], []>} : vector<32x32xf32>, vector<32x1024xf32>, vector<32x1024xf32> -> vector<32x1024xf32>
    %c0_16 = arith.constant 0 : index
    %c0_17 = arith.constant 0 : index
    %19 = vector.load %arg8[%c0_16, %c0_17] : memref<32x1xf32, #tpu.memory_space<vmem>>, vector<32x1xf32>
    %20 = vector.broadcast %19 : vector<32x1xf32> to vector<32x1024xf32>
    %21 = arith.addf %18, %20 : vector<32x1024xf32>
    %cst_18 = arith.constant 0.000000e+00 : f32
    %22 = vector.broadcast %cst_18 : f32 to vector<32x1024xf32>
    %23 = arith.maximumf %21, %22 : vector<32x1024xf32>
    %c0_19 = arith.constant 0 : index
    %c0_20 = arith.constant 0 : index
    %24 = vector.load %arg9[%c0_19, %c0_20] : memref<8x1xf32, #tpu.memory_space<vmem>>, vector<8x1xf32>
    %25 = vector.broadcast %24 : vector<8x1xf32> to vector<8x1024xf32>
    %26 = arith.mulf %25, %7 : vector<8x1024xf32>
    %cst_21 = arith.constant dense<0.000000e+00> : vector<1024xf32>
    %27 = vector.multi_reduction <add>, %26, %cst_21 [0] : vector<8x1024xf32> to vector<1024xf32>
    %28 = vector.shape_cast %27 : vector<1024xf32> to vector<1x1024xf32>
    %c0_22 = arith.constant 0 : index
    %c0_23 = arith.constant 0 : index
    %29 = vector.load %arg10[%c0_22, %c0_23] : memref<32x1xf32, #tpu.memory_space<vmem>>, vector<32x1xf32>
    %30 = vector.broadcast %29 : vector<32x1xf32> to vector<32x1024xf32>
    %31 = arith.mulf %30, %23 : vector<32x1024xf32>
    %cst_24 = arith.constant dense<0.000000e+00> : vector<1024xf32>
    %32 = vector.multi_reduction <add>, %31, %cst_24 [0] : vector<32x1024xf32> to vector<1024xf32>
    %33 = vector.shape_cast %32 : vector<1024xf32> to vector<1x1024xf32>
    %34 = arith.addf %28, %33 : vector<1x1024xf32>
    %c0_25 = arith.constant 0 : index
    %c0_26 = arith.constant 0 : index
    %35 = vector.load %arg11[%c0_25, %c0_26] : memref<1x1xf32, #tpu.memory_space<vmem>>, vector<1x1xf32>
    %36 = vector.broadcast %35 : vector<1x1xf32> to vector<1x1024xf32>
    %37 = arith.addf %34, %36 : vector<1x1024xf32>
    %c0_27 = arith.constant 0 : index
    %c0_28 = arith.constant 0 : index
    %38 = vector.load %arg12[%c0_27, %c0_28] : memref<1x1024xf32, #tpu.memory_space<vmem>>, vector<1x1024xf32>
    tpu.vector_store %arg12[%c0_27, %c0_28], %37 {strides = array<i32>} : memref<1x1024xf32, #tpu.memory_space<vmem>>, vector<1x1024xf32>,
    return
  }
  func.func @transform_0(%arg0: i32) -> (i32, i32) {
    %c0_i32 = arith.constant 0 : i32
    %c0_i32_0 = arith.constant 0 : i32
    return %arg0, %c0_i32 : i32, i32
  }
  func.func @transform_1(%arg0: i32) -> (i32, i32) {
    %c0_i32 = arith.constant 0 : i32
    %c0_i32_0 = arith.constant 0 : i32
    return %arg0, %c0_i32 : i32, i32
  }
  func.func @transform_2(%arg0: i32) -> (i32, i32) {
    %c0_i32 = arith.constant 0 : i32
    %c0_i32_0 = arith.constant 0 : i32
    %c0_i32_1 = arith.constant 0 : i32
    return %c0_i32, %c0_i32_0 : i32, i32
  }
  func.func @transform_3(%arg0: i32) -> (i32, i32) {
    %c0_i32 = arith.constant 0 : i32
    %c0_i32_0 = arith.constant 0 : i32
    %c0_i32_1 = arith.constant 0 : i32
    return %c0_i32, %c0_i32_0 : i32, i32
  }
  func.func @transform_4(%arg0: i32) -> (i32, i32) {
    %c0_i32 = arith.constant 0 : i32
    %c0_i32_0 = arith.constant 0 : i32
    %c0_i32_1 = arith.constant 0 : i32
    return %c0_i32, %c0_i32_0 : i32, i32
  }
  func.func @transform_5(%arg0: i32) -> (i32, i32) {
    %c0_i32 = arith.constant 0 : i32
    %c0_i32_0 = arith.constant 0 : i32
    %c0_i32_1 = arith.constant 0 : i32
    return %c0_i32, %c0_i32_0 : i32, i32
  }
  func.func @transform_6(%arg0: i32) -> (i32, i32) {
    %c0_i32 = arith.constant 0 : i32
    %c0_i32_0 = arith.constant 0 : i32
    %c0_i32_1 = arith.constant 0 : i32
    return %c0_i32, %c0_i32_0 : i32, i32
  }
  func.func @transform_7(%arg0: i32) -> (i32, i32) {
    %c0_i32 = arith.constant 0 : i32
    %c0_i32_0 = arith.constant 0 : i32
    %c0_i32_1 = arith.constant 0 : i32
    return %c0_i32, %c0_i32_0 : i32, i32
  }
  func.func @transform_8(%arg0: i32) -> (i32, i32) {
    %c0_i32 = arith.constant 0 : i32
    %c0_i32_0 = arith.constant 0 : i32
    %c0_i32_1 = arith.constant 0 : i32
    return %c0_i32, %c0_i32_0 : i32, i32
  }
  func.func @transform_9(%arg0: i32) -> (i32, i32) {
    %c0_i32 = arith.constant 0 : i32
    %c0_i32_0 = arith.constant 0 : i32
    %c0_i32_1 = arith.constant 0 : i32
    return %c0_i32, %c0_i32_0 : i32, i32
  }
  func.func @transform_10(%arg0: i32) -> (i32, i32) {
    %c0_i32 = arith.constant 0 : i32
    %c0_i32_0 = arith.constant 0 : i32
    %c0_i32_1 = arith.constant 0 : i32
    return %c0_i32, %c0_i32_0 : i32, i32
  }
  func.func @transform_11(%arg0: i32) -> (i32, i32) {
    %c0_i32 = arith.constant 0 : i32
    %c0_i32_0 = arith.constant 0 : i32
    return %c0_i32, %arg0 : i32, i32
  }
}

</mosaic_0001>

<bundles_post_ra>
// kernel: tpu_custom_call.1
= control target key start
LH: loop header
LB: loop body
LE: loop exit
PB: predicated region body
PF: predicated region fallthrough
CT: control target
= control target key end

     0   :  { %s4992_s0 = inlined_call_operand.vmem [shape: f32[1024,8], index: 0, kind: input, shape index: {}]   ;;  %s4993_s1 = inlined_call_operand.vmem [shape: f32[1024,32], index: 1, kind: input, shape index: {}]   ;;  %s4994_s2 = inlined_call_operand.vmem [shape: f32[8,8], index: 2, kind: input, shape index: {}]   ;;  %s4995_s3 = inlined_call_operand.vmem [shape: f32[8,1], index: 3, kind: input, shape index: {}]   ;;  %s4996_s4 = inlined_call_operand.vmem [shape: f32[64,32], index: 4, kind: input, shape index: {}]   ;;  %s4997_s5 = inlined_call_operand.vmem [shape: f32[64,1], index: 5, kind: input, shape index: {}]   ;;  %s4998_s6 = inlined_call_operand.vmem [shape: f32[32,32], index: 6, kind: input, shape index: {}]   ;;  %s4999_s7 = inlined_call_operand.vmem [shape: f32[32,1], index: 7, kind: input, shape index: {}]   ;;  %s5000_s8 = inlined_call_operand.vmem [shape: f32[8,1], index: 8, kind: input, shape index: {}]   ;;  %s5001_s9 = inlined_call_operand.vmem [shape: f32[32,1], index: 9, kind: input, shape index: {}]   ;;  %s5002_s10 = inlined_call_operand.<no memory space> [shape: f32[1,1], index: 10, kind: input, shape index: {}]   ;;  %s5003_s11 = inlined_call_operand.hbm [shape: f32[1,1024], index: 11, kind: output, shape index: {}]  }
   0x1   :  { %v16_v0 = vstv %s5002_s10 }
   0x2   :  { %17 = vst [vmem:[#allocation2] sm:$0x1] %v16_v0 }
   0x3   :  { %v73_v1 = vld [vmem:[%s4992_s0 + $0xf8] sm:$0xff]  ;;  %vm176_vm0 = vcmask 64512   ;;  %v72_v5 = vld [vmem:[%s4992_s0 + $0xf0] sm:$0xff]  ;;  %v71_v9 = vld [vmem:[%s4992_s0 + $0xe8] sm:$0xff]  ;;  %v3314_v11 = vmov 0  }
   0x4   :  { %v105_v2 = vld [vmem:[%s4992_s0 + $0x1f8] sm:$0xff]  ;;  %2958 = vmatprep.subr.msk.mxu0 %vm176_vm0, %v73_v1  ;;  %v104_v6 = vld [vmem:[%s4992_s0 + $0x1f0] sm:$0xff]  ;;  %v103_v10 = vld [vmem:[%s4992_s0 + $0x1e8] sm:$0xff]  ;;  %3291 = vset.pattern.permute.xlu1 %v3314_v11 }
   0x5   :  { %v57_v3 = vld [vmem:[%s4992_s0 + $0x78] sm:$0xff]  ;;  %2992 = vmatprep.subr.msk.mxu1 %vm176_vm0, %v105_v2  ;;  %v56_v7 = vld [vmem:[%s4992_s0 + $0x70] sm:$0xff]  ;;  %3290 = vset.pattern.permute.xlu0 %v3314_v11  ;;  %v55_v12 = vld [vmem:[%s4992_s0 + $0x68] sm:$0xff] }
   0x6   :  { %v89_v4 = vld [vmem:[%s4992_s0 + $0x178] sm:$0xff]  ;;  %2959 = vmatpush3.xpose.msk.msra.mxu0 %vm176_vm0, %v57_v3  ;;  %v88_v8 = vld [vmem:[%s4992_s0 + $0x170] sm:$0xff]  ;;  %v87_v13 = vld [vmem:[%s4992_s0 + $0x168] sm:$0xff] }
   0x7   :  { %2993 = vmatpush3.xpose.msk.msra.mxu1 %vm176_vm0, %v89_v4  ;;  %2960 = vmatprep.subr.msk.mxu0 %vm176_vm0, %v72_v5  ;;  %v70_v14 = vld [vmem:[%s4992_s0 + $0xe0] sm:$0xff]  ;;  %v69_v18 = vld [vmem:[%s4992_s0 + $0xd8] sm:$0xff]  ;;  %v68_v22 = vld [vmem:[%s4992_s0 + $0xd0] sm:$0xff] }
   0x8   :  { %2994 = vmatprep.subr.msk.mxu1 %vm176_vm0, %v104_v6  ;;  %v102_v15 = vld [vmem:[%s4992_s0 + $0x1e0] sm:$0xff]  ;;  %v101_v19 = vld [vmem:[%s4992_s0 + $0x1d8] sm:$0xff]  ;;  %v100_v23 = vld [vmem:[%s4992_s0 + $0x1d0] sm:$0xff] }
   0x9   :  { %v54_v16 = vld [vmem:[%s4992_s0 + $0x60] sm:$0xff]  ;;  %v53_v20 = vld [vmem:[%s4992_s0 + $0x58] sm:$0xff]  ;;  %v52_v24 = vld [vmem:[%s4992_s0 + $0x50] sm:$0xff] }
   0xa   :  { %2961 = vmatpush3.xpose.msk.msra.mxu0 %vm176_vm0, %v56_v7  ;;  %v86_v17 = vld [vmem:[%s4992_s0 + $0x160] sm:$0xff]  ;;  %v85_v21 = vld [vmem:[%s4992_s0 + $0x158] sm:$0xff]  ;;  %v84_v25 = vld [vmem:[%s4992_s0 + $0x150] sm:$0xff] }
   0xb   :  { %2995 = vmatpush3.xpose.msk.msra.mxu1 %vm176_vm0, %v88_v8  ;;  %2962 = vmatprep.subr.msk.mxu0 %vm176_vm0, %v71_v9  ;;  %v67_v26 = vld [vmem:[%s4992_s0 + $0xc8] sm:$0xff]  ;;  %v3484_v28 = vld [vmem:[%s4994_s2] sm:$0xff]  ;;  %v65_v35 = vld [vmem:[%s4992_s0 + $0xb8] sm:$0xff] }
   0xc   :  { %2996 = vmatprep.subr.msk.mxu1 %vm176_vm0, %v103_v10  ;;  %v99_v27 = vld [vmem:[%s4992_s0 + $0x1c8] sm:$0xff]  ;;  %v66_v31 = vld [vmem:[%s4992_s0 + $0xc0] sm:$0xff]  ;;  %2990 = vmatprep.mubr.msk.f32.mxu0 %vm176_vm0, %v3484_v28  ;;  %v97_v36 = vld [vmem:[%s4992_s0 + $0x1b8] sm:$0xff] }
   0xd   :  { %v51_v29 = vld [vmem:[%s4992_s0 + $0x48] sm:$0xff]  ;;  %v98_v32 = vld [vmem:[%s4992_s0 + $0x1c0] sm:$0xff]  ;;  %3024 = vmatprep.mubr.msk.f32.mxu1 %vm176_vm0, %v3484_v28  ;;  %v49_v37 = vld [vmem:[%s4992_s0 + $0x38] sm:$0xff] }
   0xe   :  { %2963 = vmatpush3.xpose.msk.msra.mxu0 %vm176_vm0, %v55_v12  ;;  %v83_v30 = vld [vmem:[%s4992_s0 + $0x148] sm:$0xff]  ;;  %v50_v33 = vld [vmem:[%s4992_s0 + $0x40] sm:$0xff]  ;;  %v81_v38 = vld [vmem:[%s4992_s0 + $0x138] sm:$0xff] }
   0xf   :  { %2997 = vmatpush3.xpose.msk.msra.mxu1 %vm176_vm0, %v87_v13  ;;  %2964 = vmatprep.subr.msk.mxu0 %vm176_vm0, %v70_v14  ;;  %v82_v34 = vld [vmem:[%s4992_s0 + $0x140] sm:$0xff]  ;;  %v64_v39 = vld [vmem:[%s4992_s0 + $0xb0] sm:$0xff]  ;;  %v63_v44 = vld [vmem:[%s4992_s0 + $0xa8] sm:$0xff] }
  0x10   :  { %2998 = vmatprep.subr.msk.mxu1 %vm176_vm0, %v102_v15  ;;  %v96_v40 = vld [vmem:[%s4992_s0 + $0x1b0] sm:$0xff]  ;;  %v95_v45 = vld [vmem:[%s4992_s0 + $0x1a8] sm:$0xff]  ;;  %v995_v46 = vld [vmem:[%s4997_s5 + $0x18] sm:$0xff] }
  0x11   :  { %v48_v41 = vld [vmem:[%s4992_s0 + $0x30] sm:$0xff]  ;;  %1017 = vperm.xlu0 %3290, %v995_v46   ;;  %v999_v48 = vld [vmem:[%s4997_s5 + $0x38] sm:$0xff]  ;;  %v47_v49 = vld [vmem:[%s4992_s0 + $0x28] sm:$0xff] }
  0x12   :  { %2965 = vmatpush3.xpose.msk.msra.mxu0 %vm176_vm0, %v54_v16  ;;  %v80_v42 = vld [vmem:[%s4992_s0 + $0x130] sm:$0xff]  ;;  %v79_v50 = vld [vmem:[%s4992_s0 + $0x128] sm:$0xff]  ;;  %v62_v51 = vld [vmem:[%s4992_s0 + $0xa0] sm:$0xff] }
  0x13   :  { %2999 = vmatpush3.xpose.msk.msra.mxu1 %vm176_vm0, %v86_v17  ;;  %2966 = vmatprep.subr.msk.mxu0 %vm176_vm0, %v69_v18  ;;  %v994_v43 = vld [vmem:[%s4997_s5 + $0x10] sm:$0xff]  ;;  %v94_v52 = vld [vmem:[%s4992_s0 + $0x1a0] sm:$0xff]  ;;  %v997_v53 = vld [vmem:[%s4997_s5 + $0x28] sm:$0xff] }
  0x14   :  { %3000 = vmatprep.subr.msk.mxu1 %vm176_vm0, %v101_v19  ;;  %1012 = vperm.xlu1 %3291, %v994_v43   ;;  %v998_v47 = vld [vmem:[%s4997_s5 + $0x30] sm:$0xff]  ;;  %v993_v54 = vld [vmem:[%s4997_s5 + $0x8] sm:$0xff]  ;;  %v46_v55 = vld [vmem:[%s4992_s0 + $0x20] sm:$0xff] }
  0x15   :  { %1037 = vperm.xlu0 %3290, %v999_v48   ;;  %v78_v56 = vld [vmem:[%s4992_s0 + $0x120] sm:$0xff]  ;;  %v61_v57 = vld [vmem:[%s4992_s0 + $0x98] sm:$0xff]  ;;  %v60_v63 = vld [vmem:[%s4992_s0 + $0x90] sm:$0xff] }
  0x16   :  { %2967 = vmatpush3.xpose.msk.msra.mxu0 %vm176_vm0, %v53_v20  ;;  %v93_v58 = vld [vmem:[%s4992_s0 + $0x198] sm:$0xff]  ;;  %v996_v59 = vld [vmem:[%s4997_s5 + $0x20] sm:$0xff]  ;;  %v92_v0 = vld [vmem:[%s4992_s0 + $0x190] sm:$0xff] }
  0x17   :  { %3001 = vmatpush3.xpose.msk.msra.mxu1 %vm176_vm0, %v85_v21  ;;  %2968 = vmatprep.subr.msk.mxu0 %vm176_vm0, %v68_v22  ;;  %v992_v60 = vld [vmem:[%s4997_s5] sm:$0xff]  ;;  %v45_v61 = vld [vmem:[%s4992_s0 + $0x18] sm:$0xff]  ;;  %v1938_v1 = vld [vmem:[%s4999_s7 + $0x8] sm:$0xff] }
  0x18   :  { %3002 = vmatprep.subr.msk.mxu1 %vm176_vm0, %v100_v23  ;;  %1032 = vperm.xlu1 %3291, %v998_v47   ;;  %v77_v62 = vld [vmem:[%s4992_s0 + $0x118] sm:$0xff]  ;;  %v1937_v2 = vld [vmem:[%s4999_s7] sm:$0xff]  ;;  %v44_v3 = vld [vmem:[%s4992_s0 + $0x10] sm:$0xff] }
  0x19   :  { %1007 = vperm.xlu0 %3290, %v993_v54   ;;  %v76_v4 = vld [vmem:[%s4992_s0 + $0x110] sm:$0xff]  ;;  %v59_v5 = vld [vmem:[%s4992_s0 + $0x88] sm:$0xff]  ;;  %v1940_v7 = vld [vmem:[%s4999_s7 + $0x18] sm:$0xff] }
  0x1a   :  { %2969 = vmatpush3.xpose.msk.msra.mxu0 %vm176_vm0, %v52_v24  ;;  %v91_v6 = vld [vmem:[%s4992_s0 + $0x188] sm:$0xff]  ;;  %v1939_v8 = vld [vmem:[%s4999_s7 + $0x10] sm:$0xff]  ;;  %v58_v11 = vld [vmem:[%s4992_s0 + $0x80] sm:$0xff] }
  0x1b   :  { %3003 = vmatpush3.xpose.msk.msra.mxu1 %vm176_vm0, %v84_v25  ;;  %2970 = vmatprep.subr.msk.mxu0 %vm176_vm0, %v67_v26  ;;  %v43_v9 = vld [vmem:[%s4992_s0 + $0x8] sm:$0xff]  ;;  %v90_v12 = vld [vmem:[%s4992_s0 + $0x180] sm:$0xff]  ;;  %v137_v17 = vld [vmem:[%s4992_s0 + $0x2f8] sm:$0xff] }
  0x1c   :  { %3004 = vmatprep.subr.msk.mxu1 %vm176_vm0, %v99_v27  ;;  %1027 = vperm.xlu1 %3291, %v997_v53   ;;  %v75_v10 = vld [vmem:[%s4992_s0 + $0x108] sm:$0xff]  ;;  %v2423_v14 = vld [vmem:[%s5001_s9] sm:$0xff]  ;;  %v169_v18 = vld [vmem:[%s4992_s0 + $0x3f8] sm:$0xff] }
  0x1d   :  { %1002 = vperm.xlu0 %3290, %v992_v60   ;;  %v2424_v13 = vld [vmem:[%s5001_s9 + $0x8] sm:$0xff]  ;;  %v42_v15 = vld [vmem:[%s4992_s0] sm:$0xff]  ;;  %v2425_v19 = vld [vmem:[%s5001_s9 + $0x10] sm:$0xff] }
  0x1e   :  { %2971 = vmatpush3.xpose.msk.msra.mxu0 %vm176_vm0, %v51_v29  ;;  %v74_v16 = vld [vmem:[%s4992_s0 + $0x100] sm:$0xff]  ;;  %v121_v20 = vld [vmem:[%s4992_s0 + $0x278] sm:$0xff]  ;;  %v136_v22 = vld [vmem:[%s4992_s0 + $0x2f0] sm:$0xff] }
  0x1f   :  { %3005 = vmatpush3.xpose.msk.msra.mxu1 %vm176_vm0, %v83_v30  ;;  %2972 = vmatprep.subr.msk.mxu0 %vm176_vm0, %v66_v31  ;;  %v153_v21 = vld [vmem:[%s4992_s0 + $0x378] sm:$0xff]  ;;  %v168_v23 = vld [vmem:[%s4992_s0 + $0x3f0] sm:$0xff]  ;;  %v170_v24 = vld [vmem:[%s4995_s3] sm:$0xff] }
  0x20   :  { %3006 = vmatprep.subr.msk.mxu1 %vm176_vm0, %v98_v32  ;;  %1022 = vperm.xlu1 %3291, %v996_v59   ;;  %v2361_v25 = vld [vmem:[%s5000_s8] sm:$0xff]  ;;  %v120_v26 = vld [vmem:[%s4992_s0 + $0x270] sm:$0xff]  ;;  %v135_v29 = vld [vmem:[%s4992_s0 + $0x2e8] sm:$0xff] }
  0x21   :  { %1943 = vperm.xlu0 %3290, %v1937_v2   ;;  %v152_v27 = vld [vmem:[%s4992_s0 + $0x370] sm:$0xff]  ;;  %v167_v30 = vld [vmem:[%s4992_s0 + $0x3e8] sm:$0xff] }
  0x22   :  { %2973 = vmatpush3.xpose.msk.msra.mxu0 %vm176_vm0, %v50_v33  ;;  %v119_v31 = vld [vmem:[%s4992_s0 + $0x268] sm:$0xff]  ;;  %v134_v33 = vld [vmem:[%s4992_s0 + $0x2e0] sm:$0xff] }
  0x23   :  { %3007 = vmatpush3.xpose.msk.msra.mxu1 %vm176_vm0, %v82_v34  ;;  %2974 = vmatprep.subr.msk.mxu0 %vm176_vm0, %v65_v35  ;;  %v151_v32 = vld [vmem:[%s4992_s0 + $0x368] sm:$0xff]  ;;  %v166_v34 = vld [vmem:[%s4992_s0 + $0x3e0] sm:$0xff] }
  0x24   :  { %3008 = vmatprep.subr.msk.mxu1 %vm176_vm0, %v97_v36  ;;  %1948 = vperm.xlu1 %3291, %v1938_v1   ;;  %v118_v35 = vld [vmem:[%s4992_s0 + $0x260] sm:$0xff] }
  0x25   :  { %1953 = vperm.xlu0 %3290, %v1939_v8   ;;  %v150_v36 = vld [vmem:[%s4992_s0 + $0x360] sm:$0xff] }
  0x26   :  { %2975 = vmatpush3.xpose.msk.msra.mxu0 %vm176_vm0, %v49_v37 }
  0x27   :  { %3009 = vmatpush3.xpose.msk.msra.mxu1 %vm176_vm0, %v81_v38  ;;  %2976 = vmatprep.subr.msk.mxu0 %vm176_vm0, %v64_v39 }
  0x28   :  { %3010 = vmatprep.subr.msk.mxu1 %vm176_vm0, %v96_v40  ;;  %1958 = vperm.xlu1 %3291, %v1940_v7  }
  0x29   :  { %2429 = vperm.xlu0 %3290, %v2423_v14  }
  0x2a   :  { %2977 = vmatpush3.xpose.msk.msra.mxu0 %vm176_vm0, %v48_v41 }
  0x2b   :  { %3011 = vmatpush3.xpose.msk.msra.mxu1 %vm176_vm0, %v80_v42  ;;  %2978 = vmatprep.subr.msk.mxu0 %vm176_vm0, %v63_v44 }
  0x2c   :  { %3012 = vmatprep.subr.msk.mxu1 %vm176_vm0, %v95_v45  ;;  %2434 = vperm.xlu1 %3291, %v2424_v13  }
  0x2d   :  { %173 = vperm.xlu0 %3290, %v170_v24  }
  0x2e   :  { %2979 = vmatpush3.xpose.msk.msra.mxu0 %vm176_vm0, %v47_v49 }
  0x2f   :  { %3013 = vmatpush3.xpose.msk.msra.mxu1 %vm176_vm0, %v79_v50  ;;  %2980 = vmatprep.subr.msk.mxu0 %vm176_vm0, %v62_v51 }
  0x30   :  { %3014 = vmatprep.subr.msk.mxu1 %vm176_vm0, %v94_v52  ;;  %2439 = vperm.xlu1 %3291, %v2425_v19  }
  0x32   :  { %2981 = vmatpush3.xpose.msk.msra.mxu0 %vm176_vm0, %v46_v55 }
  0x33   :  { %3015 = vmatpush3.xpose.msk.msra.mxu1 %vm176_vm0, %v78_v56  ;;  %2982 = vmatprep.subr.msk.mxu0 %vm176_vm0, %v61_v57 }
  0x34   :  { %3016 = vmatprep.subr.msk.mxu1 %vm176_vm0, %v93_v58  ;;  %2364 = vperm.xlu1 %3291, %v2361_v25  }
  0x36   :  { %2983 = vmatpush3.xpose.msk.msra.mxu0 %vm176_vm0, %v45_v61 }
  0x37   :  { %3017 = vmatpush3.xpose.msk.msra.mxu1 %vm176_vm0, %v77_v62  ;;  %2984 = vmatprep.subr.msk.mxu0 %vm176_vm0, %v60_v63 }
  0x38   :  { %3018 = vmatprep.subr.msk.mxu1 %vm176_vm0, %v92_v0 }
  0x3a   :  { %2985 = vmatpush3.xpose.msk.msra.mxu0 %vm176_vm0, %v44_v3 }
  0x3b   :  { %3019 = vmatpush3.xpose.msk.msra.mxu1 %vm176_vm0, %v76_v4  ;;  %2986 = vmatprep.subr.msk.mxu0 %vm176_vm0, %v59_v5 }
  0x3c   :  { %3020 = vmatprep.subr.msk.mxu1 %vm176_vm0, %v91_v6 }
  0x3e   :  { %2987 = vmatpush3.xpose.msk.msra.mxu0 %vm176_vm0, %v43_v9 }
  0x3f   :  { %3021 = vmatpush3.xpose.msk.msra.mxu1 %vm176_vm0, %v75_v10  ;;  %2988 = vmatprep.subr.msk.mxu0 %vm176_vm0, %v58_v11 }
  0x40   :  { %3022 = vmatprep.subr.msk.mxu1 %vm176_vm0, %v90_v12 }
  0x42   :  { %2989 = vmatpush3.xpose.msk.msra.mxu0 %vm176_vm0, %v42_v15 }
  0x43   :  { %3023 = vmatpush3.xpose.msk.msra.mxu1 %vm176_vm0, %v74_v16  ;;  %3026 = vmatprep.subr.msk.mxu0 %vm176_vm0, %v137_v17 }
  0x44   :  { %3060 = vmatprep.subr.msk.mxu1 %vm176_vm0, %v169_v18 }
  0x45   :  { %2991 = vmatmul.mubr.msk.f32.vlgmr.msra.gmra.mxu0 %vm176_vm0, %v3484_v28 }
  0x46   :  { %3025 = vmatmul.mubr.msk.f32.vlgmr.msra.gmra.mxu1 %vm176_vm0, %v3484_v28  ;;  %3027 = vmatpush3.xpose.msk.msra.mxu0 %vm176_vm0, %v121_v20 }
  0x47   :  { %3061 = vmatpush3.xpose.msk.msra.mxu1 %vm176_vm0, %v153_v21  ;;  %3028 = vmatprep.subr.msk.mxu0 %vm176_vm0, %v136_v22 }
  0x48   :  { %3062 = vmatprep.subr.msk.mxu1 %vm176_vm0, %v168_v23  ;;  %3058 = vmatprep.mubr.msk.f32.mxu0 %vm176_vm0, %v3484_v28 }
  0x49   :  { %3092 = vmatprep.mubr.msk.f32.mxu1 %vm176_vm0, %v3484_v28 }
  0x4a   :  { %3029 = vmatpush3.xpose.msk.msra.mxu0 %vm176_vm0, %v120_v26 }
  0x4b   :  { %3063 = vmatpush3.xpose.msk.msra.mxu1 %vm176_vm0, %v152_v27  ;;  %3030 = vmatprep.subr.msk.mxu0 %vm176_vm0, %v135_v29 }
  0x4c   :  { %3064 = vmatprep.subr.msk.mxu1 %vm176_vm0, %v167_v30 }
  0x4e   :  { %3031 = vmatpush3.xpose.msk.msra.mxu0 %vm176_vm0, %v119_v31 }
  0x4f   :  { %3065 = vmatpush3.xpose.msk.msra.mxu1 %vm176_vm0, %v151_v32  ;;  %3032 = vmatprep.subr.msk.mxu0 %vm176_vm0, %v134_v33 }
  0x50   :  { %3066 = vmatprep.subr.msk.mxu1 %vm176_vm0, %v166_v34 }
  0x51   :  { %18 = vsyncpa [#allocation4], 0  ;;  %v133_v37 = vld [vmem:[%s4992_s0 + $0x2d8] sm:$0xff]  ;;  %v132_v41 = vld [vmem:[%s4992_s0 + $0x2d0] sm:$0xff]  ;;  %vm1040_vm1 = vcmask 261120  }
  0x52   :  { %v165_v38 = vld [vmem:[%s4992_s0 + $0x3d8] sm:$0xff]  ;;  %3033 = vmatpush3.xpose.msk.msra.mxu0 %vm176_vm0, %v118_v35  ;;  %v164_v42 = vld [vmem:[%s4992_s0 + $0x3d0] sm:$0xff]  ;;  %v131_v45 = vld [vmem:[%s4992_s0 + $0x2c8] sm:$0xff] }
  0x53   :  { %3067 = vmatpush3.xpose.msk.msra.mxu1 %vm176_vm0, %v150_v36  ;;  %3034 = vmatprep.subr.msk.mxu0 %vm176_vm0, %v133_v37  ;;  %v117_v39 = vld [vmem:[%s4992_s0 + $0x258] sm:$0xff]  ;;  %v116_v43 = vld [vmem:[%s4992_s0 + $0x250] sm:$0xff]  ;;  %v163_v46 = vld [vmem:[%s4992_s0 + $0x3c8] sm:$0xff] }
  0x54   :  { %3068 = vmatprep.subr.msk.mxu1 %vm176_vm0, %v165_v38  ;;  %v149_v40 = vld [vmem:[%s4992_s0 + $0x358] sm:$0xff]  ;;  %v148_v44 = vld [vmem:[%s4992_s0 + $0x350] sm:$0xff]  ;;  %v115_v47 = vld [vmem:[%s4992_s0 + $0x248] sm:$0xff] }
  0x55   :  { %v147_v48 = vld [vmem:[%s4992_s0 + $0x348] sm:$0xff]  ;;  %v130_v49 = vld [vmem:[%s4992_s0 + $0x2c0] sm:$0xff]  ;;  %v129_v53 = vld [vmem:[%s4992_s0 + $0x2b8] sm:$0xff] }
  0x56   :  { %3035 = vmatpush3.xpose.msk.msra.mxu0 %vm176_vm0, %v117_v39  ;;  %v162_v50 = vld [vmem:[%s4992_s0 + $0x3c0] sm:$0xff]  ;;  %v161_v54 = vld [vmem:[%s4992_s0 + $0x3b8] sm:$0xff]  ;;  %v128_v57 = vld [vmem:[%s4992_s0 + $0x2b0] sm:$0xff] }
  0x57   :  { %3069 = vmatpush3.xpose.msk.msra.mxu1 %vm176_vm0, %v149_v40  ;;  %3036 = vmatprep.subr.msk.mxu0 %vm176_vm0, %v132_v41  ;;  %v114_v51 = vld [vmem:[%s4992_s0 + $0x240] sm:$0xff]  ;;  %v113_v55 = vld [vmem:[%s4992_s0 + $0x238] sm:$0xff]  ;;  %v160_v58 = vld [vmem:[%s4992_s0 + $0x3b0] sm:$0xff] }
  0x58   :  { %3070 = vmatprep.subr.msk.mxu1 %vm176_vm0, %v164_v42  ;;  %v146_v52 = vld [vmem:[%s4992_s0 + $0x340] sm:$0xff]  ;;  %v145_v56 = vld [vmem:[%s4992_s0 + $0x338] sm:$0xff]  ;;  %v112_v59 = vld [vmem:[%s4992_s0 + $0x230] sm:$0xff] }
  0x59   :  { %v144_v60 = vld [vmem:[%s4992_s0 + $0x330] sm:$0xff]  ;;  %v127_v61 = vld [vmem:[%s4992_s0 + $0x2a8] sm:$0xff]  ;;  %v126_v1 = vld [vmem:[%s4992_s0 + $0x2a0] sm:$0xff] }
  0x5a   :  { %3037 = vmatpush3.xpose.msk.msra.mxu0 %vm176_vm0, %v116_v43  ;;  %v159_v62 = vld [vmem:[%s4992_s0 + $0x3a8] sm:$0xff]  ;;  %v158_v2 = vld [vmem:[%s4992_s0 + $0x3a0] sm:$0xff]  ;;  %v125_v5 = vld [vmem:[%s4992_s0 + $0x298] sm:$0xff] }
  0x5b   :  { %3071 = vmatpush3.xpose.msk.msra.mxu1 %vm176_vm0, %v148_v44  ;;  %3038 = vmatprep.subr.msk.mxu0 %vm176_vm0, %v131_v45  ;;  %v111_v63 = vld [vmem:[%s4992_s0 + $0x228] sm:$0xff]  ;;  %v110_v3 = vld [vmem:[%s4992_s0 + $0x220] sm:$0xff]  ;;  %v157_v6 = vld [vmem:[%s4992_s0 + $0x398] sm:$0xff] }
  0x5c   :  { %3072 = vmatprep.subr.msk.mxu1 %vm176_vm0, %v163_v46  ;;  %v143_v0 = vld [vmem:[%s4992_s0 + $0x328] sm:$0xff]  ;;  %v142_v4 = vld [vmem:[%s4992_s0 + $0x320] sm:$0xff]  ;;  %v109_v7 = vld [vmem:[%s4992_s0 + $0x218] sm:$0xff] }
  0x5d   :  { %v141_v8 = vld [vmem:[%s4992_s0 + $0x318] sm:$0xff]  ;;  %v124_v9 = vld [vmem:[%s4992_s0 + $0x290] sm:$0xff]  ;;  %v123_v13 = vld [vmem:[%s4992_s0 + $0x288] sm:$0xff] }
  0x5e   :  { %3039 = vmatpush3.xpose.msk.msra.mxu0 %vm176_vm0, %v115_v47  ;;  %v156_v10 = vld [vmem:[%s4992_s0 + $0x390] sm:$0xff]  ;;  %v155_v14 = vld [vmem:[%s4992_s0 + $0x388] sm:$0xff]  ;;  %v122_v17 = vld [vmem:[%s4992_s0 + $0x280] sm:$0xff] }
  0x5f   :  { %3073 = vmatpush3.xpose.msk.msra.mxu1 %vm176_vm0, %v147_v48  ;;  %3040 = vmatprep.subr.msk.mxu0 %vm176_vm0, %v130_v49  ;;  %v108_v11 = vld [vmem:[%s4992_s0 + $0x210] sm:$0xff]  ;;  %v107_v15 = vld [vmem:[%s4992_s0 + $0x208] sm:$0xff]  ;;  %v154_v18 = vld [vmem:[%s4992_s0 + $0x380] sm:$0xff] }
  0x60   :  { %3074 = vmatprep.subr.msk.mxu1 %vm176_vm0, %v162_v50  ;;  %v140_v12 = vld [vmem:[%s4992_s0 + $0x310] sm:$0xff]  ;;  %v139_v16 = vld [vmem:[%s4992_s0 + $0x308] sm:$0xff]  ;;  %v106_v19 = vld [vmem:[%s4992_s0 + $0x200] sm:$0xff] }
  0x61   :  { %v138_v20 = vld [vmem:[%s4992_s0 + $0x300] sm:$0xff]  ;;  %v895_v21 = vld [vmem:[%s4993_s1 + $0xf8] sm:$0xff]  ;;  %v894_v25 = vld [vmem:[%s4993_s1 + $0xf0] sm:$0xff] }
  0x62   :  { %3041 = vmatpush3.xpose.msk.msra.mxu0 %vm176_vm0, %v114_v51  ;;  %v927_v22 = vld [vmem:[%s4993_s1 + $0x1f8] sm:$0xff]  ;;  %v926_v26 = vld [vmem:[%s4993_s1 + $0x1f0] sm:$0xff]  ;;  %v3988_v27 = vld [vmem:[%s4996_s4] sm:$0xff] }
  0x63   :  { %3075 = vmatpush3.xpose.msk.msra.mxu1 %vm176_vm0, %v146_v52  ;;  %3042 = vmatprep.subr.msk.mxu0 %vm176_vm0, %v129_v53  ;;  %v879_v23 = vld [vmem:[%s4993_s1 + $0x78] sm:$0xff]  ;;  %v878_v29 = vld [vmem:[%s4993_s1 + $0x70] sm:$0xff]  ;;  %v893_v30 = vld [vmem:[%s4993_s1 + $0xe8] sm:$0xff] }
  0x64   :  { %3076 = vmatprep.subr.msk.mxu1 %vm176_vm0, %v161_v54  ;;  %v911_v24 = vld [vmem:[%s4993_s1 + $0x178] sm:$0xff]  ;;  %v925_v31 = vld [vmem:[%s4993_s1 + $0x1e8] sm:$0xff]  ;;  %v892_v34 = vld [vmem:[%s4993_s1 + $0xe0] sm:$0xff] }
  0x65   :  { %v877_v32 = vld [vmem:[%s4993_s1 + $0x68] sm:$0xff]  ;;  %v924_v35 = vld [vmem:[%s4993_s1 + $0x1e0] sm:$0xff]  ;;  %v891_v38 = vld [vmem:[%s4993_s1 + $0xd8] sm:$0xff] }
  0x66   :  { %3043 = vmatpush3.xpose.msk.msra.mxu0 %vm176_vm0, %v113_v55  ;;  %v909_v33 = vld [vmem:[%s4993_s1 + $0x168] sm:$0xff]  ;;  %v876_v36 = vld [vmem:[%s4993_s1 + $0x60] sm:$0xff]  ;;  %v923_v39 = vld [vmem:[%s4993_s1 + $0x1d8] sm:$0xff] }
  0x67   :  { %3077 = vmatpush3.xpose.msk.msra.mxu1 %vm176_vm0, %v145_v56  ;;  %3044 = vmatprep.subr.msk.mxu0 %vm176_vm0, %v128_v57  ;;  %v908_v37 = vld [vmem:[%s4993_s1 + $0x160] sm:$0xff]  ;;  %v875_v40 = vld [vmem:[%s4993_s1 + $0x58] sm:$0xff]  ;;  %v890_v42 = vld [vmem:[%s4993_s1 + $0xd0] sm:$0xff] }
  0x68   :  { %3078 = vmatprep.subr.msk.mxu1 %vm176_vm0, %v160_v58  ;;  %v907_v41 = vld [vmem:[%s4993_s1 + $0x158] sm:$0xff]  ;;  %v922_v43 = vld [vmem:[%s4993_s1 + $0x1d0] sm:$0xff]  ;;  %v889_v46 = vld [vmem:[%s4993_s1 + $0xc8] sm:$0xff] }
  0x69   :  { %v874_v44 = vld [vmem:[%s4993_s1 + $0x50] sm:$0xff]  ;;  %v921_v47 = vld [vmem:[%s4993_s1 + $0x1c8] sm:$0xff]  ;;  %v888_v50 = vld [vmem:[%s4993_s1 + $0xc0] sm:$0xff] }
  0x6a   :  { %3045 = vmatpush3.xpose.msk.msra.mxu0 %vm176_vm0, %v112_v59  ;;  %v906_v45 = vld [vmem:[%s4993_s1 + $0x150] sm:$0xff]  ;;  %v873_v48 = vld [vmem:[%s4993_s1 + $0x48] sm:$0xff]  ;;  %v920_v51 = vld [vmem:[%s4993_s1 + $0x1c0] sm:$0xff] }
  0x6b   :  { %3079 = vmatpush3.xpose.msk.msra.mxu1 %vm176_vm0, %v144_v60  ;;  %3046 = vmatprep.subr.msk.mxu0 %vm176_vm0, %v127_v61  ;;  %v905_v49 = vld [vmem:[%s4993_s1 + $0x148] sm:$0xff]  ;;  %v872_v52 = vld [vmem:[%s4993_s1 + $0x40] sm:$0xff]  ;;  %v887_v54 = vld [vmem:[%s4993_s1 + $0xb8] sm:$0xff] }
  0x6c   :  { %3080 = vmatprep.subr.msk.mxu1 %vm176_vm0, %v159_v62  ;;  %v904_v53 = vld [vmem:[%s4993_s1 + $0x140] sm:$0xff]  ;;  %v919_v55 = vld [vmem:[%s4993_s1 + $0x1b8] sm:$0xff]  ;;  %v886_v59 = vld [vmem:[%s4993_s1 + $0xb0] sm:$0xff] }
  0x6d   :  { %v2426_v56 = vld [vmem:[%s5001_s9 + $0x18] sm:$0xff]  ;;  %v918_v60 = vld [vmem:[%s4993_s1 + $0x1b0] sm:$0xff]  ;;  %v2559_v61 = vld [vmem:[#allocation2] sm:$0x1] }
  0x6e   :  { %3047 = vmatpush3.xpose.msk.msra.mxu0 %vm176_vm0, %v111_v63  ;;  %v871_v57 = vld [vmem:[%s4993_s1 + $0x38] sm:$0xff]  ;;  %2444 = vperm.xlu0 %3290, %v2426_v56   ;;  %v870_v62 = vld [vmem:[%s4993_s1 + $0x30] sm:$0xff]  ;;  %v985_v56 = vld [vmem:[%s4993_s1 + $0x3c8] sm:$0xff] }
  0x6f   :  { %3081 = vmatpush3.xpose.msk.msra.mxu1 %vm176_vm0, %v143_v0  ;;  %3048 = vmatprep.subr.msk.mxu0 %vm176_vm0, %v126_v1  ;;  %v903_v58 = vld [vmem:[%s4993_s1 + $0x138] sm:$0xff]  ;;  %v902_v63 = vld [vmem:[%s4993_s1 + $0x130] sm:$0xff]  ;;  %v885_v0 = vld [vmem:[%s4993_s1 + $0xa8] sm:$0xff] }
  0x70   :  { %3082 = vmatprep.subr.msk.mxu1 %vm176_vm0, %v158_v2  ;;  %v917_v1 = vld [vmem:[%s4993_s1 + $0x1a8] sm:$0xff] }
  0x71   :  { %v869_v2 = vld [vmem:[%s4993_s1 + $0x28] sm:$0xff] }
  0x72   :  { %3049 = vmatpush3.xpose.msk.msra.mxu0 %vm176_vm0, %v110_v3  ;;  %2562 = vperm.xlu0 %3290, %v2559_v61   ;;  %v901_v3 = vld [vmem:[%s4993_s1 + $0x128] sm:$0xff]  ;;  %v984_v61 = vld [vmem:[%s4993_s1 + $0x3c0] sm:$0xff] }
  0x73   :  { %3083 = vmatpush3.xpose.msk.msra.mxu1 %vm176_vm0, %v142_v4  ;;  %3050 = vmatprep.subr.msk.mxu0 %vm176_vm0, %v125_v5  ;;  %v884_v4 = vld [vmem:[%s4993_s1 + $0xa0] sm:$0xff] }
  0x74   :  { %3084 = vmatprep.subr.msk.mxu1 %vm176_vm0, %v157_v6  ;;  %v916_v5 = vld [vmem:[%s4993_s1 + $0x1a0] sm:$0xff] }
  0x75   :  { %v868_v6 = vld [vmem:[%s4993_s1 + $0x20] sm:$0xff] }
  0x76   :  { %3051 = vmatpush3.xpose.msk.msra.mxu0 %vm176_vm0, %v109_v7  ;;  %v900_v7 = vld [vmem:[%s4993_s1 + $0x120] sm:$0xff] }
  0x77   :  { %3085 = vmatpush3.xpose.msk.msra.mxu1 %vm176_vm0, %v141_v8  ;;  %3052 = vmatprep.subr.msk.mxu0 %vm176_vm0, %v124_v9  ;;  %v883_v8 = vld [vmem:[%s4993_s1 + $0x98] sm:$0xff] }
  0x78   :  { %3086 = vmatprep.subr.msk.mxu1 %vm176_vm0, %v156_v10  ;;  %v915_v9 = vld [vmem:[%s4993_s1 + $0x198] sm:$0xff] }
  0x79   :  { %v867_v10 = vld [vmem:[%s4993_s1 + $0x18] sm:$0xff] }
  0x7a   :  { %3053 = vmatpush3.xpose.msk.msra.mxu0 %vm176_vm0, %v108_v11  ;;  %v899_v11 = vld [vmem:[%s4993_s1 + $0x118] sm:$0xff] }
  0x7b   :  { %3087 = vmatpush3.xpose.msk.msra.mxu1 %vm176_vm0, %v140_v12  ;;  %3054 = vmatprep.subr.msk.mxu0 %vm176_vm0, %v123_v13  ;;  %v882_v12 = vld [vmem:[%s4993_s1 + $0x90] sm:$0xff] }
  0x7c   :  { %3088 = vmatprep.subr.msk.mxu1 %vm176_vm0, %v155_v14  ;;  %v914_v13 = vld [vmem:[%s4993_s1 + $0x190] sm:$0xff] }
  0x7d   :  { %v866_v14 = vld [vmem:[%s4993_s1 + $0x10] sm:$0xff] }
  0x7e   :  { %3055 = vmatpush3.xpose.msk.msra.mxu0 %vm176_vm0, %v107_v15  ;;  %v898_v15 = vld [vmem:[%s4993_s1 + $0x110] sm:$0xff] }
  0x7f   :  { %3089 = vmatpush3.xpose.msk.msra.mxu1 %vm176_vm0, %v139_v16  ;;  %3056 = vmatprep.subr.msk.mxu0 %vm176_vm0, %v122_v17  ;;  %v881_v16 = vld [vmem:[%s4993_s1 + $0x88] sm:$0xff] }
  0x80   :  { %3090 = vmatprep.subr.msk.mxu1 %vm176_vm0, %v154_v18  ;;  %v913_v17 = vld [vmem:[%s4993_s1 + $0x188] sm:$0xff] }
  0x81   :  { %v865_v18 = vld [vmem:[%s4993_s1 + $0x8] sm:$0xff] }
  0x82   :  { %3057 = vmatpush3.xpose.msk.msra.mxu0 %vm176_vm0, %v106_v19  ;;  %v897_v19 = vld [vmem:[%s4993_s1 + $0x108] sm:$0xff] }
  0x83   :  { %3091 = vmatpush3.xpose.msk.msra.mxu1 %vm176_vm0, %v138_v20  ;;  %3094 = vmatprep.subr.msk.mxu0 %vm1040_vm1, %v895_v21  ;;  %v880_v20 = vld [vmem:[%s4993_s1 + $0x80] sm:$0xff] }
  0x84   :  { %3142 = vmatprep.subr.msk.mxu1 %vm1040_vm1, %v927_v22  ;;  %v912_v21 = vld [vmem:[%s4993_s1 + $0x180] sm:$0xff] }
  0x85   :  { %3059 = vmatmul.mubr.msk.f32.vlgmr.msra.gmra.mxu0 %vm176_vm0, %v3484_v28  ;;  %v864_v22 = vld [vmem:[%s4993_s1] sm:$0xff] }
  0x86   :  { %3093 = vmatmul.mubr.msk.f32.vlgmr.msra.gmra.mxu1 %vm176_vm0, %v3484_v28  ;;  %3095 = vmatpush3.xpose.msk.msra.mxu0 %vm1040_vm1, %v879_v23  ;;  %v910_v28 = vld [vmem:[%s4993_s1 + $0x170] sm:$0xff]  ;;  %v896_v23 = vld [vmem:[%s4993_s1 + $0x100] sm:$0xff] }
  0x87   :  { %3143 = vmatpush3.xpose.msk.msra.mxu1 %vm1040_vm1, %v911_v24  ;;  %3096 = vmatprep.subr.msk.mxu0 %vm1040_vm1, %v894_v25  ;;  %v959_v24 = vld [vmem:[%s4993_s1 + $0x2f8] sm:$0xff] }
  0x88   :  { %3144 = vmatprep.subr.msk.mxu1 %vm1040_vm1, %v926_v26  ;;  %3126 = vmatprep.mubr.msk.f32.mxu0 %vm1040_vm1, %v3988_v27  ;;  %v991_v25 = vld [vmem:[%s4993_s1 + $0x3f8] sm:$0xff] }
  0x89   :  { %3174 = vmatprep.mubr.msk.f32.mxu1 %vm1040_vm1, %v3988_v27  ;;  %v943_v26 = vld [vmem:[%s4993_s1 + $0x278] sm:$0xff] }
  0x8a   :  { %3097 = vmatpush3.xpose.msk.msra.mxu0 %vm1040_vm1, %v878_v29  ;;  %v975_v29 = vld [vmem:[%s4993_s1 + $0x378] sm:$0xff] }
  0x8b   :  { %3145 = vmatpush3.xpose.msk.msra.mxu1 %vm1040_vm1, %v910_v28  ;;  %3098 = vmatprep.subr.msk.mxu0 %vm1040_vm1, %v893_v30  ;;  %v4250_v28 = vld [vmem:[%s4996_s4 + $0x8] sm:$0xff]  ;;  %v958_v30 = vld [vmem:[%s4993_s1 + $0x2f0] sm:$0xff] }
  0x8c   :  { %3146 = vmatprep.subr.msk.mxu1 %vm1040_vm1, %v925_v31  ;;  %v990_v31 = vld [vmem:[%s4993_s1 + $0x3f0] sm:$0xff] }
  0x8e   :  { %3099 = vmatpush3.xpose.msk.msra.mxu0 %vm1040_vm1, %v877_v32  ;;  %v942_v32 = vld [vmem:[%s4993_s1 + $0x270] sm:$0xff] }
  0x8f   :  { %3147 = vmatpush3.xpose.msk.msra.mxu1 %vm1040_vm1, %v909_v33  ;;  %3100 = vmatprep.subr.msk.mxu0 %vm1040_vm1, %v892_v34  ;;  %v974_v33 = vld [vmem:[%s4993_s1 + $0x370] sm:$0xff] }
  0x90   :  { %3148 = vmatprep.subr.msk.mxu1 %vm1040_vm1, %v924_v35  ;;  %v4279_v34 = vld [vmem:[%s4996_s4 + $0x10] sm:$0xff]  ;;  %v957_v35 = vld [vmem:[%s4993_s1 + $0x2e8] sm:$0xff] }
  0x92   :  { %3101 = vmatpush3.xpose.msk.msra.mxu0 %vm1040_vm1, %v876_v36  ;;  %v989_v36 = vld [vmem:[%s4993_s1 + $0x3e8] sm:$0xff] }
  0x93   :  { %3149 = vmatpush3.xpose.msk.msra.mxu1 %vm1040_vm1, %v908_v37  ;;  %3102 = vmatprep.subr.msk.mxu0 %vm1040_vm1, %v891_v38  ;;  %v941_v37 = vld [vmem:[%s4993_s1 + $0x268] sm:$0xff] }
  0x94   :  { %3150 = vmatprep.subr.msk.mxu1 %vm1040_vm1, %v923_v39  ;;  %v973_v38 = vld [vmem:[%s4993_s1 + $0x368] sm:$0xff]  ;;  %v4308_v39 = vld [vmem:[%s4996_s4 + $0x18] sm:$0xff] }
  0x96   :  { %3103 = vmatpush3.xpose.msk.msra.mxu0 %vm1040_vm1, %v875_v40  ;;  %v956_v40 = vld [vmem:[%s4993_s1 + $0x2e0] sm:$0xff] }
  0x97   :  { %3151 = vmatpush3.xpose.msk.msra.mxu1 %vm1040_vm1, %v907_v41  ;;  %3104 = vmatprep.subr.msk.mxu0 %vm1040_vm1, %v890_v42  ;;  %v988_v41 = vld [vmem:[%s4993_s1 + $0x3e0] sm:$0xff] }
  0x98   :  { %3152 = vmatprep.subr.msk.mxu1 %vm1040_vm1, %v922_v43  ;;  %v940_v42 = vld [vmem:[%s4993_s1 + $0x260] sm:$0xff] }
  0x99   :  { %v972_v43 = vld [vmem:[%s4993_s1 + $0x360] sm:$0xff] }
  0x9a   :  { %3105 = vmatpush3.xpose.msk.msra.mxu0 %vm1040_vm1, %v874_v44  ;;  %v4337_v44 = vld [vmem:[%s4996_s4 + $0x20] sm:$0xff] }
  0x9b   :  { %3153 = vmatpush3.xpose.msk.msra.mxu1 %vm1040_vm1, %v906_v45  ;;  %3106 = vmatprep.subr.msk.mxu0 %vm1040_vm1, %v889_v46  ;;  %v955_v45 = vld [vmem:[%s4993_s1 + $0x2d8] sm:$0xff] }
  0x9c   :  { %3154 = vmatprep.subr.msk.mxu1 %vm1040_vm1, %v921_v47  ;;  %v987_v46 = vld [vmem:[%s4993_s1 + $0x3d8] sm:$0xff] }
  0x9d   :  { %v939_v47 = vld [vmem:[%s4993_s1 + $0x258] sm:$0xff] }
  0x9e   :  { %3107 = vmatpush3.xpose.msk.msra.mxu0 %vm1040_vm1, %v873_v48  ;;  %v971_v48 = vld [vmem:[%s4993_s1 + $0x358] sm:$0xff] }
  0x9f   :  { %3155 = vmatpush3.xpose.msk.msra.mxu1 %vm1040_vm1, %v905_v49  ;;  %3108 = vmatprep.subr.msk.mxu0 %vm1040_vm1, %v888_v50  ;;  %v4366_v49 = vld [vmem:[%s4996_s4 + $0x28] sm:$0xff]  ;;  %v954_v50 = vld [vmem:[%s4993_s1 + $0x2d0] sm:$0xff] }
  0xa0   :  { %3156 = vmatprep.subr.msk.mxu1 %vm1040_vm1, %v920_v51  ;;  %v986_v51 = vld [vmem:[%s4993_s1 + $0x3d0] sm:$0xff] }
  0xa2   :  { %3109 = vmatpush3.xpose.msk.msra.mxu0 %vm1040_vm1, %v872_v52  ;;  %v938_v52 = vld [vmem:[%s4993_s1 + $0x250] sm:$0xff] }
  0xa3   :  { %3157 = vmatpush3.xpose.msk.msra.mxu1 %vm1040_vm1, %v904_v53  ;;  %3110 = vmatprep.subr.msk.mxu0 %vm1040_vm1, %v887_v54  ;;  %v970_v53 = vld [vmem:[%s4993_s1 + $0x350] sm:$0xff] }
  0xa4   :  { %3158 = vmatprep.subr.msk.mxu1 %vm1040_vm1, %v919_v55  ;;  %v4395_v54 = vld [vmem:[%s4996_s4 + $0x30] sm:$0xff]  ;;  %v953_v55 = vld [vmem:[%s4993_s1 + $0x2c8] sm:$0xff] }
  0xa6   :  { %3111 = vmatpush3.xpose.msk.msra.mxu0 %vm1040_vm1, %v871_v57  ;;  %v937_v57 = vld [vmem:[%s4993_s1 + $0x248] sm:$0xff] }
  0xa7   :  { %3159 = vmatpush3.xpose.msk.msra.mxu1 %vm1040_vm1, %v903_v58  ;;  %3112 = vmatprep.subr.msk.mxu0 %vm1040_vm1, %v886_v59  ;;  %v969_v58 = vld [vmem:[%s4993_s1 + $0x348] sm:$0xff]  ;;  %v4424_v59 = vld [vmem:[%s4996_s4 + $0x38] sm:$0xff] }
  0xa8   :  { %3160 = vmatprep.subr.msk.mxu1 %vm1040_vm1, %v918_v60  ;;  %v952_v60 = vld [vmem:[%s4993_s1 + $0x2c0] sm:$0xff] }
  0xaa   :  { %3113 = vmatpush3.xpose.msk.msra.mxu0 %vm1040_vm1, %v870_v62  ;;  %v936_v62 = vld [vmem:[%s4993_s1 + $0x240] sm:$0xff] }
  0xab   :  { %3161 = vmatpush3.xpose.msk.msra.mxu1 %vm1040_vm1, %v902_v63  ;;  %3114 = vmatprep.subr.msk.mxu0 %vm1040_vm1, %v885_v0  ;;  %v968_v63 = vld [vmem:[%s4993_s1 + $0x340] sm:$0xff]  ;;  %v951_v0 = vld [vmem:[%s4993_s1 + $0x2b8] sm:$0xff] }
  0xac   :  { %3162 = vmatprep.subr.msk.mxu1 %vm1040_vm1, %v917_v1  ;;  %v983_v1 = vld [vmem:[%s4993_s1 + $0x3b8] sm:$0xff] }
  0xae   :  { %3115 = vmatpush3.xpose.msk.msra.mxu0 %vm1040_vm1, %v869_v2  ;;  %v935_v2 = vld [vmem:[%s4993_s1 + $0x238] sm:$0xff] }
  0xaf   :  { %3163 = vmatpush3.xpose.msk.msra.mxu1 %vm1040_vm1, %v901_v3  ;;  %3116 = vmatprep.subr.msk.mxu0 %vm1040_vm1, %v884_v4  ;;  %v967_v3 = vld [vmem:[%s4993_s1 + $0x338] sm:$0xff]  ;;  %v950_v4 = vld [vmem:[%s4993_s1 + $0x2b0] sm:$0xff] }
  0xb0   :  { %3164 = vmatprep.subr.msk.mxu1 %vm1040_vm1, %v916_v5  ;;  %v982_v5 = vld [vmem:[%s4993_s1 + $0x3b0] sm:$0xff] }
  0xb2   :  { %3117 = vmatpush3.xpose.msk.msra.mxu0 %vm1040_vm1, %v868_v6  ;;  %v934_v6 = vld [vmem:[%s4993_s1 + $0x230] sm:$0xff] }
  0xb3   :  { %3165 = vmatpush3.xpose.msk.msra.mxu1 %vm1040_vm1, %v900_v7  ;;  %3118 = vmatprep.subr.msk.mxu0 %vm1040_vm1, %v883_v8  ;;  %v966_v7 = vld [vmem:[%s4993_s1 + $0x330] sm:$0xff]  ;;  %v949_v8 = vld [vmem:[%s4993_s1 + $0x2a8] sm:$0xff] }
  0xb4   :  { %3166 = vmatprep.subr.msk.mxu1 %vm1040_vm1, %v915_v9  ;;  %v981_v9 = vld [vmem:[%s4993_s1 + $0x3a8] sm:$0xff] }
  0xb6   :  { %3119 = vmatpush3.xpose.msk.msra.mxu0 %vm1040_vm1, %v867_v10  ;;  %v933_v10 = vld [vmem:[%s4993_s1 + $0x228] sm:$0xff] }
  0xb7   :  { %3167 = vmatpush3.xpose.msk.msra.mxu1 %vm1040_vm1, %v899_v11  ;;  %3120 = vmatprep.subr.msk.mxu0 %vm1040_vm1, %v882_v12  ;;  %v965_v11 = vld [vmem:[%s4993_s1 + $0x328] sm:$0xff]  ;;  %v948_v12 = vld [vmem:[%s4993_s1 + $0x2a0] sm:$0xff] }
  0xb8   :  { %3168 = vmatprep.subr.msk.mxu1 %vm1040_vm1, %v914_v13  ;;  %v980_v13 = vld [vmem:[%s4993_s1 + $0x3a0] sm:$0xff] }
  0xba   :  { %3121 = vmatpush3.xpose.msk.msra.mxu0 %vm1040_vm1, %v866_v14  ;;  %v932_v14 = vld [vmem:[%s4993_s1 + $0x220] sm:$0xff] }
  0xbb   :  { %3169 = vmatpush3.xpose.msk.msra.mxu1 %vm1040_vm1, %v898_v15  ;;  %3122 = vmatprep.subr.msk.mxu0 %vm1040_vm1, %v881_v16  ;;  %v964_v15 = vld [vmem:[%s4993_s1 + $0x320] sm:$0xff]  ;;  %v947_v16 = vld [vmem:[%s4993_s1 + $0x298] sm:$0xff] }
  0xbc   :  { %3170 = vmatprep.subr.msk.mxu1 %vm1040_vm1, %v913_v17  ;;  %v979_v17 = vld [vmem:[%s4993_s1 + $0x398] sm:$0xff] }
  0xbe   :  { %3123 = vmatpush3.xpose.msk.msra.mxu0 %vm1040_vm1, %v865_v18  ;;  %v931_v18 = vld [vmem:[%s4993_s1 + $0x218] sm:$0xff] }
  0xbf   :  { %3171 = vmatpush3.xpose.msk.msra.mxu1 %vm1040_vm1, %v897_v19  ;;  %3124 = vmatprep.subr.msk.mxu0 %vm1040_vm1, %v880_v20  ;;  %v963_v19 = vld [vmem:[%s4993_s1 + $0x318] sm:$0xff]  ;;  %v946_v20 = vld [vmem:[%s4993_s1 + $0x290] sm:$0xff] }
  0xc0   :  { %3172 = vmatprep.subr.msk.mxu1 %vm1040_vm1, %v912_v21  ;;  %v978_v21 = vld [vmem:[%s4993_s1 + $0x390] sm:$0xff] }
  0xc2   :  { %3125 = vmatpush3.xpose.msk.msra.mxu0 %vm1040_vm1, %v864_v22  ;;  %v930_v22 = vld [vmem:[%s4993_s1 + $0x210] sm:$0xff] }
  0xc3   :  { %3173 = vmatpush3.xpose.msk.msra.mxu1 %vm1040_vm1, %v896_v23  ;;  %3190 = vmatprep.subr.msk.mxu0 %vm1040_vm1, %v959_v24  ;;  %v962_v23 = vld [vmem:[%s4993_s1 + $0x310] sm:$0xff]  ;;  %v945_v24 = vld [vmem:[%s4993_s1 + $0x288] sm:$0xff] }
  0xc4   :  { %3238 = vmatprep.subr.msk.mxu1 %vm1040_vm1, %v991_v25  ;;  %v977_v25 = vld [vmem:[%s4993_s1 + $0x388] sm:$0xff] }
  0xc5   :  { %3127 = vmatmul.mubr.msk.f32.vlgmr.msra.gmra.mxu0 %vm1040_vm1, %v3988_v27 }
  0xc6   :  { %3175 = vmatmul.mubr.msk.f32.vlgmr.msra.gmra.mxu1 %vm1040_vm1, %v3988_v27  ;;  %3191 = vmatpush3.xpose.msk.msra.mxu0 %vm1040_vm1, %v943_v26  ;;  %v929_v26 = vld [vmem:[%s4993_s1 + $0x208] sm:$0xff] }
  0xc7   :  { %3239 = vmatpush3.xpose.msk.msra.mxu1 %vm1040_vm1, %v975_v29  ;;  %3128 = vmatprep.mubr.msk.f32.mxu0 %vm1040_vm1, %v4250_v28  ;;  %v961_v29 = vld [vmem:[%s4993_s1 + $0x308] sm:$0xff] }
  0xc8   :  { %3176 = vmatprep.mubr.msk.f32.mxu1 %vm1040_vm1, %v4250_v28  ;;  %3192 = vmatprep.subr.msk.mxu0 %vm1040_vm1, %v958_v30  ;;  %v944_v30 = vld [vmem:[%s4993_s1 + $0x280] sm:$0xff] }
  0xc9   :  { %3240 = vmatprep.subr.msk.mxu1 %vm1040_vm1, %v990_v31  ;;  %3129 = vmatmul.mubr.msk.f32.gmra.mxu0 %vm1040_vm1, %v4250_v28  ;;  %v976_v31 = vld [vmem:[%s4993_s1 + $0x380] sm:$0xff] }
  0xca   :  { %3177 = vmatmul.mubr.msk.f32.gmra.mxu1 %vm1040_vm1, %v4250_v28  ;;  %3193 = vmatpush3.xpose.msk.msra.mxu0 %vm1040_vm1, %v942_v32  ;;  %v928_v32 = vld [vmem:[%s4993_s1 + $0x200] sm:$0xff] }
  0xcb   :  { %3241 = vmatpush3.xpose.msk.msra.mxu1 %vm1040_vm1, %v974_v33  ;;  %3130 = vmatprep.mubr.msk.f32.mxu0 %vm1040_vm1, %v4279_v34  ;;  %v960_v33 = vld [vmem:[%s4993_s1 + $0x300] sm:$0xff] }
  0xcc   :  { %3178 = vmatprep.mubr.msk.f32.mxu1 %vm1040_vm1, %v4279_v34  ;;  %3194 = vmatprep.subr.msk.mxu0 %vm1040_vm1, %v957_v35 }
  0xcd   :  { %3242 = vmatprep.subr.msk.mxu1 %vm1040_vm1, %v989_v36  ;;  %3131 = vmatmul.mubr.msk.f32.gmra.mxu0 %vm1040_vm1, %v4279_v34 }
  0xce   :  { %3179 = vmatmul.mubr.msk.f32.gmra.mxu1 %vm1040_vm1, %v4279_v34  ;;  %3195 = vmatpush3.xpose.msk.msra.mxu0 %vm1040_vm1, %v941_v37 }
  0xcf   :  { %3243 = vmatpush3.xpose.msk.msra.mxu1 %vm1040_vm1, %v973_v38  ;;  %3132 = vmatprep.mubr.msk.f32.mxu0 %vm1040_vm1, %v4308_v39 }
  0xd0   :  { %3180 = vmatprep.mubr.msk.f32.mxu1 %vm1040_vm1, %v4308_v39  ;;  %3196 = vmatprep.subr.msk.mxu0 %vm1040_vm1, %v956_v40 }
  0xd1   :  { %3244 = vmatprep.subr.msk.mxu1 %vm1040_vm1, %v988_v41  ;;  %3133 = vmatmul.mubr.msk.f32.gmra.mxu0 %vm1040_vm1, %v4308_v39 }
  0xd2   :  { %3181 = vmatmul.mubr.msk.f32.gmra.mxu1 %vm1040_vm1, %v4308_v39  ;;  %3197 = vmatpush3.xpose.msk.msra.mxu0 %vm1040_vm1, %v940_v42 }
  0xd3   :  { %3245 = vmatpush3.xpose.msk.msra.mxu1 %vm1040_vm1, %v972_v43  ;;  %3134 = vmatprep.mubr.msk.f32.mxu0 %vm1040_vm1, %v4337_v44 }
  0xd4   :  { %3182 = vmatprep.mubr.msk.f32.mxu1 %vm1040_vm1, %v4337_v44  ;;  %3198 = vmatprep.subr.msk.mxu0 %vm1040_vm1, %v955_v45 }
  0xd5   :  { %3246 = vmatprep.subr.msk.mxu1 %vm1040_vm1, %v987_v46  ;;  %3135 = vmatmul.mubr.msk.f32.gmra.mxu0 %vm1040_vm1, %v4337_v44 }
  0xd6   :  { %3183 = vmatmul.mubr.msk.f32.gmra.mxu1 %vm1040_vm1, %v4337_v44  ;;  %3199 = vmatpush3.xpose.msk.msra.mxu0 %vm1040_vm1, %v939_v47 }
  0xd7   :  { %3247 = vmatpush3.xpose.msk.msra.mxu1 %vm1040_vm1, %v971_v48  ;;  %3136 = vmatprep.mubr.msk.f32.mxu0 %vm1040_vm1, %v4366_v49 }
  0xd8   :  { %3184 = vmatprep.mubr.msk.f32.mxu1 %vm1040_vm1, %v4366_v49  ;;  %3200 = vmatprep.subr.msk.mxu0 %vm1040_vm1, %v954_v50 }
  0xd9   :  { %3248 = vmatprep.subr.msk.mxu1 %vm1040_vm1, %v986_v51  ;;  %3137 = vmatmul.mubr.msk.f32.gmra.mxu0 %vm1040_vm1, %v4366_v49 }
  0xda   :  { %3185 = vmatmul.mubr.msk.f32.gmra.mxu1 %vm1040_vm1, %v4366_v49  ;;  %3201 = vmatpush3.xpose.msk.msra.mxu0 %vm1040_vm1, %v938_v52 }
  0xdb   :  { %3249 = vmatpush3.xpose.msk.msra.mxu1 %vm1040_vm1, %v970_v53  ;;  %3138 = vmatprep.mubr.msk.f32.mxu0 %vm1040_vm1, %v4395_v54 }
  0xdc   :  { %3186 = vmatprep.mubr.msk.f32.mxu1 %vm1040_vm1, %v4395_v54  ;;  %3202 = vmatprep.subr.msk.mxu0 %vm1040_vm1, %v953_v55  ;;  %v4674_v55 = vpop.permute.xlu0 %1017 }
  0xdd   :  { %3250 = vmatprep.subr.msk.mxu1 %vm1040_vm1, %v985_v56  ;;  %3139 = vmatmul.mubr.msk.f32.gmra.mxu0 %vm1040_vm1, %v4395_v54 }
  0xde   :  { %3187 = vmatmul.mubr.msk.f32.gmra.mxu1 %vm1040_vm1, %v4395_v54  ;;  %3203 = vmatpush3.xpose.msk.msra.mxu0 %vm1040_vm1, %v937_v57 }
  0xdf   :  { %3251 = vmatpush3.xpose.msk.msra.mxu1 %vm1040_vm1, %v969_v58  ;;  %3140 = vmatprep.mubr.msk.f32.mxu0 %vm1040_vm1, %v4424_v59  ;;  %v4676_v58 = vpop.permute.xlu1 %1012 }
  0xe0   :  { %3188 = vmatprep.mubr.msk.f32.mxu1 %vm1040_vm1, %v4424_v59  ;;  %3204 = vmatprep.subr.msk.mxu0 %vm1040_vm1, %v952_v60 }
  0xe1   :  { %3252 = vmatprep.subr.msk.mxu1 %vm1040_vm1, %v984_v61  ;;  %3141 = vmatmul.mubr.msk.f32.gmra.mxu0 %vm1040_vm1, %v4424_v59 }
  0xe2   :  { %3189 = vmatmul.mubr.msk.f32.gmra.mxu1 %vm1040_vm1, %v4424_v59  ;;  %3205 = vmatpush3.xpose.msk.msra.mxu0 %vm1040_vm1, %v936_v62 }
  0xe3   :  { %3253 = vmatpush3.xpose.msk.msra.mxu1 %vm1040_vm1, %v968_v63  ;;  %3206 = vmatprep.subr.msk.mxu0 %vm1040_vm1, %v951_v0  ;;  %v4678_v63 = vpop.permute.xlu0 %1037 }
  0xe4   :  { %3254 = vmatprep.subr.msk.mxu1 %vm1040_vm1, %v983_v1  ;;  %3222 = vmatprep.mubr.msk.f32.mxu0 %vm1040_vm1, %v3988_v27 }
  0xe5   :  { %3270 = vmatprep.mubr.msk.f32.mxu1 %vm1040_vm1, %v3988_v27 }
  0xe6   :  { %3207 = vmatpush3.xpose.msk.msra.mxu0 %vm1040_vm1, %v935_v2  ;;  %v4680_v2 = vpop.permute.xlu1 %1032 }
  0xe7   :  { %3255 = vmatpush3.xpose.msk.msra.mxu1 %vm1040_vm1, %v967_v3  ;;  %3208 = vmatprep.subr.msk.mxu0 %vm1040_vm1, %v950_v4 }
  0xe8   :  { %3256 = vmatprep.subr.msk.mxu1 %vm1040_vm1, %v982_v5 }
  0xea   :  { %3209 = vmatpush3.xpose.msk.msra.mxu0 %vm1040_vm1, %v934_v6 }
  0xeb   :  { %3257 = vmatpush3.xpose.msk.msra.mxu1 %vm1040_vm1, %v966_v7  ;;  %3210 = vmatprep.subr.msk.mxu0 %vm1040_vm1, %v949_v8  ;;  %v4682_v7 = vpop.permute.xlu0 %1007 }
  0xec   :  { %3258 = vmatprep.subr.msk.mxu1 %vm1040_vm1, %v981_v9 }
  0xee   :  { %3211 = vmatpush3.xpose.msk.msra.mxu0 %vm1040_vm1, %v933_v10 }
  0xef   :  { %3259 = vmatpush3.xpose.msk.msra.mxu1 %vm1040_vm1, %v965_v11  ;;  %3212 = vmatprep.subr.msk.mxu0 %vm1040_vm1, %v948_v12  ;;  %v4686_v12 = vpop.permute.xlu1 %1027 }
  0xf0   :  { %3260 = vmatprep.subr.msk.mxu1 %vm1040_vm1, %v980_v13 }
  0xf2   :  { %3213 = vmatpush3.xpose.msk.msra.mxu0 %vm1040_vm1, %v932_v14 }
  0xf3   :  { %3261 = vmatpush3.xpose.msk.msra.mxu1 %vm1040_vm1, %v964_v15  ;;  %3214 = vmatprep.subr.msk.mxu0 %vm1040_vm1, %v947_v16 }
  0xf4   :  { %3262 = vmatprep.subr.msk.mxu1 %vm1040_vm1, %v979_v17 }
  0xf6   :  { %3215 = vmatpush3.xpose.msk.msra.mxu0 %vm1040_vm1, %v931_v18 }
  0xf7   :  { %3263 = vmatpush3.xpose.msk.msra.mxu1 %vm1040_vm1, %v963_v19  ;;  %3216 = vmatprep.subr.msk.mxu0 %vm1040_vm1, %v946_v20 }
  0xf8   :  { %3264 = vmatprep.subr.msk.mxu1 %vm1040_vm1, %v978_v21 }
  0xfa   :  { %3217 = vmatpush3.xpose.msk.msra.mxu0 %vm1040_vm1, %v930_v22 }
  0xfb   :  { %3265 = vmatpush3.xpose.msk.msra.mxu1 %vm1040_vm1, %v962_v23  ;;  %3218 = vmatprep.subr.msk.mxu0 %vm1040_vm1, %v945_v24 }
  0xfc   :  { %3266 = vmatprep.subr.msk.mxu1 %vm1040_vm1, %v977_v25 }
  0xfe   :  { %3219 = vmatpush3.xpose.msk.msra.mxu0 %vm1040_vm1, %v929_v26 }
  0xff   :  { %3267 = vmatpush3.xpose.msk.msra.mxu1 %vm1040_vm1, %v961_v29  ;;  %3220 = vmatprep.subr.msk.mxu0 %vm1040_vm1, %v944_v30 }
 0x100   :  { %3268 = vmatprep.subr.msk.mxu1 %vm1040_vm1, %v976_v31 }
 0x102   :  { %3221 = vmatpush3.xpose.msk.msra.mxu0 %vm1040_vm1, %v928_v32 }
 0x103   :  { %3269 = vmatpush3.xpose.msk.msra.mxu1 %vm1040_vm1, %v960_v33 }
 0x105   :  { %3223 = vmatmul.mubr.msk.f32.vlgmr.msra.gmra.mxu0 %vm1040_vm1, %v3988_v27 }
 0x106   :  { %3271 = vmatmul.mubr.msk.f32.vlgmr.msra.gmra.mxu1 %vm1040_vm1, %v3988_v27  ;;  %3224 = vmatprep.mubr.msk.f32.mxu0 %vm1040_vm1, %v4250_v28  ;;  %v3315_v27 = vmov 0.0  }
 0x107   :  { %3272 = vmatprep.mubr.msk.f32.mxu1 %vm1040_vm1, %v4250_v28 }
 0x109   :  { %3225 = vmatmul.mubr.msk.f32.gmra.mxu0 %vm1040_vm1, %v4250_v28 }
 0x10a   :  { %3273 = vmatmul.mubr.msk.f32.gmra.mxu1 %vm1040_vm1, %v4250_v28  ;;  %3226 = vmatprep.mubr.msk.f32.mxu0 %vm1040_vm1, %v4279_v34  ;;  %v4650_v28 = vpop.f32.mrf.mxu0 }
 0x10b   :  { %3274 = vmatprep.mubr.msk.f32.mxu1 %vm1040_vm1, %v4279_v34 }
 0x10c   :  { %v4654_v35 = vpop.f32.mrf.mxu0 }
 0x10d   :  { %3227 = vmatmul.mubr.msk.f32.gmra.mxu0 %vm1040_vm1, %v4279_v34 }
 0x10e   :  { %3275 = vmatmul.mubr.msk.f32.gmra.mxu1 %vm1040_vm1, %v4279_v34  ;;  %3228 = vmatprep.mubr.msk.f32.mxu0 %vm1040_vm1, %v4308_v39  ;;  %v4652_v34 = vpop.f32.mrf.mxu1 }
 0x10f   :  { %3276 = vmatprep.mubr.msk.f32.mxu1 %vm1040_vm1, %v4308_v39 }
 0x110   :  { %v4656_v36 = vpop.f32.mrf.mxu1 }
 0x111   :  { %3229 = vmatmul.mubr.msk.f32.gmra.mxu0 %vm1040_vm1, %v4308_v39 }
 0x112   :  { %3277 = vmatmul.mubr.msk.f32.gmra.mxu1 %vm1040_vm1, %v4308_v39  ;;  %3230 = vmatprep.mubr.msk.f32.mxu0 %vm1040_vm1, %v4337_v44 }
 0x113   :  { %3278 = vmatprep.mubr.msk.f32.mxu1 %vm1040_vm1, %v4337_v44 }
 0x115   :  { %3231 = vmatmul.mubr.msk.f32.gmra.mxu0 %vm1040_vm1, %v4337_v44 }
 0x116   :  { %3279 = vmatmul.mubr.msk.f32.gmra.mxu1 %vm1040_vm1, %v4337_v44  ;;  %3232 = vmatprep.mubr.msk.f32.mxu0 %vm1040_vm1, %v4366_v49 }
 0x117   :  { %3280 = vmatprep.mubr.msk.f32.mxu1 %vm1040_vm1, %v4366_v49 }
 0x119   :  { %3233 = vmatmul.mubr.msk.f32.gmra.mxu0 %vm1040_vm1, %v4366_v49 }
 0x11a   :  { %3281 = vmatmul.mubr.msk.f32.gmra.mxu1 %vm1040_vm1, %v4366_v49  ;;  %3234 = vmatprep.mubr.msk.f32.mxu0 %vm1040_vm1, %v4395_v54 }
 0x11b   :  { %3282 = vmatprep.mubr.msk.f32.mxu1 %vm1040_vm1, %v4395_v54 }
 0x11d   :  { %3235 = vmatmul.mubr.msk.f32.gmra.mxu0 %vm1040_vm1, %v4395_v54 }
 0x11e   :  { %3283 = vmatmul.mubr.msk.f32.gmra.mxu1 %vm1040_vm1, %v4395_v54  ;;  %3236 = vmatprep.mubr.msk.f32.mxu0 %vm1040_vm1, %v4424_v59 }
 0x11f   :  { %3284 = vmatprep.mubr.msk.f32.mxu1 %vm1040_vm1, %v4424_v59 }
 0x121   :  { %3237 = vmatmul.mubr.msk.f32.gmra.mxu0 %vm1040_vm1, %v4424_v59 }
 0x122   :  { %3285 = vmatmul.mubr.msk.f32.gmra.mxu1 %vm1040_vm1, %v4424_v59  ;;  %2037 = vmatprep.mubr.f32.mxu0 %v3315_v27 }
 0x123   :  { %2126 = vmatprep.mubr.f32.mxu1 %v3315_v27 }
 0x145   :  { %v4658_v37 = vpop.f32.mrf.mxu0 }
 0x146   :  { %v4660_v38 = vpop.f32.mrf.mxu1 }
 0x147   :  { %v4662_v39 = vpop.f32.mrf.mxu0 }
 0x148   :  { %v4664_v40 = vpop.f32.mrf.mxu1 }
 0x185   :  { %v4666_v41 = vpop.f32.mrf.mxu0 }
 0x186   :  { %v4668_v42 = vpop.f32.mrf.mxu1 }
 0x187   :  { %v4670_v43 = vpop.f32.mrf.mxu0 }
 0x188   :  { %v4672_v44 = vpop.f32.mrf.mxu1 }
 0x189   :  { %v1521_v45 = vpop.f32.mrf.mxu0 }
 0x18a   :  { %v1634_v46 = vpop.f32.mrf.mxu1  ;;  %v1522_v8 = vadd.f32 %v1521_v45, %v4682_v7 }
 0x18b   :  { %v1523_v47 = vpop.f32.mrf.mxu0  ;;  %v1635_v9 = vadd.f32 %v1634_v46, %v4682_v7 }
 0x18c   :  { %v1636_v48 = vpop.f32.mrf.mxu1  ;;  %v1524_v13 = vadd.f32 %v1523_v47, %v4682_v7 }
 0x18d   :  { %v1527_v49 = vpop.f32.mrf.mxu0  ;;  %v1637_v14 = vadd.f32 %v1636_v48, %v4682_v7 }
 0x18e   :  { %v1640_v50 = vpop.f32.mrf.mxu1  ;;  %v1528_v29 = vadd.f32 %v1527_v49, %v4676_v58 }
 0x18f   :  { %v1529_v51 = vpop.f32.mrf.mxu0  ;;  %v1641_v30 = vadd.f32 %v1640_v50, %v4676_v58 }
 0x190   :  { %v1642_v52 = vpop.f32.mrf.mxu1  ;;  %v1530_v15 = vadd.f32 %v1529_v51, %v4676_v58 }
 0x191   :  { %v1533_v53 = vpop.f32.mrf.mxu0  ;;  %v1643_v16 = vadd.f32 %v1642_v52, %v4676_v58 }
 0x192   :  { %v1646_v54 = vpop.f32.mrf.mxu1  ;;  %v1534_v17 = vadd.f32 %v1533_v53, %v4674_v55 }
 0x193   :  { %v1535_v56 = vpop.f32.mrf.mxu0  ;;  %v1647_v18 = vadd.f32 %v1646_v54, %v4674_v55  ;;  %v4710_v54 = vpop.permute.xlu1 %1022 }
 0x194   :  { %v1648_v57 = vpop.f32.mrf.mxu1  ;;  %v1536_v19 = vadd.f32 %v1535_v56, %v4674_v55 }
 0x195   :  { %v1539_v59 = vpop.f32.mrf.mxu0  ;;  %v1649_v20 = vadd.f32 %v1648_v57, %v4674_v55 }
 0x196   :  { %v1652_v60 = vpop.f32.mrf.mxu1 }
 0x197   :  { %v1541_v61 = vpop.f32.mrf.mxu0 }
 0x198   :  { %v1654_v62 = vpop.f32.mrf.mxu1 }
 0x199   :  { %v1545_v0 = vpop.f32.mrf.mxu0 }
 0x19a   :  { %v1658_v1 = vpop.f32.mrf.mxu1  ;;  %v1546_v52 = vadd.f32 %v1545_v0, %v4686_v12 }
 0x19b   :  { %v1547_v3 = vpop.f32.mrf.mxu0  ;;  %v1659_v49 = vadd.f32 %v1658_v1, %v4686_v12  ;;  %v4715_v1 = vpop.permute.xlu0 %1002 }
 0x19c   :  { %v1660_v4 = vpop.f32.mrf.mxu1  ;;  %v1548_v46 = vadd.f32 %v1547_v3, %v4686_v12  ;;  %v1540_v3 = vadd.f32 %v1539_v59, %v4710_v54  ;;  %v1518_v59 = vadd.f32 %v4670_v43, %v4715_v1  ;;  %v4729_v43 = vld [vmem:[%s4998_s6] sm:$0xff] }
 0x19d   :  { %v1551_v5 = vpop.f32.mrf.mxu0  ;;  %v1661_v47 = vadd.f32 %v1660_v4, %v4686_v12  ;;  %v1542_v4 = vadd.f32 %v1541_v61, %v4710_v54  ;;  %v1631_v61 = vadd.f32 %v4672_v44, %v4715_v1  ;;  %v4762_v44 = vld [vmem:[%s4998_s6 + $0x18] sm:$0xff] }
 0x19e   :  { %v1664_v6 = vpop.f32.mrf.mxu1  ;;  %v1552_v31 = vadd.f32 %v1551_v5, %v4680_v2 }
 0x19f   :  { %v1553_v10 = vpop.f32.mrf.mxu0  ;;  %v1665_v32 = vadd.f32 %v1664_v6, %v4680_v2  ;;  %v1912_v0 = vmul.f32 %v1661_v47, %v1637_v14 }
 0x1a0   :  { %v1666_v11 = vpop.f32.mrf.mxu1  ;;  %v1554_v23 = vadd.f32 %v1553_v10, %v4680_v2  ;;  %v1917_v10 = vmul.f32 %v1552_v31, %v1528_v29 }
 0x1a1   :  { %v1557_v21 = vpop.f32.mrf.mxu0  ;;  %v1667_v24 = vadd.f32 %v1666_v11, %v4680_v2  ;;  %v1919_v11 = vmul.f32 %v1665_v32, %v1641_v30 }
 0x1a2   :  { %v1670_v22 = vpop.f32.mrf.mxu1  ;;  %v1558_v25 = vadd.f32 %v1557_v21, %v4678_v63  ;;  %v1918_v56 = vmul.f32 %v1554_v23, %v1530_v15  ;;  %v1655_v21 = vadd.f32 %v1654_v62, %v4710_v54  ;;  %v1909_v15 = vmul.f32 %v1546_v52, %v1522_v8 }
 0x1a3   :  { %v1671_v26 = vadd.f32 %v1670_v22, %v4678_v63  ;;  %v1559_v33 = vpop.f32.mrf.mxu0  ;;  %v1920_v57 = vmul.f32 %v1667_v24, %v1643_v16  ;;  %v1910_v22 = vmul.f32 %v1548_v46, %v1524_v13  ;;  %v1911_v16 = vmul.f32 %v1659_v49, %v1635_v9 }
 0x1a4   :  { %v1672_v45 = vpop.f32.mrf.mxu1  ;;  %v1560_v48 = vadd.f32 %v1559_v33, %v4678_v63  ;;  %v1925_v53 = vmul.f32 %v1558_v25, %v1534_v17  ;;  %v1653_v17 = vadd.f32 %v1652_v60, %v4710_v54  ;;  %v1516_v62 = vadd.f32 %v4666_v41, %v4715_v1  ;;  %v4740_v41 = vld [vmem:[%s4998_s6 + $0x8] sm:$0xff] }
 0x1a5   :  { %v1673_v51 = vadd.f32 %v1672_v45, %v4678_v63  ;;  %v1927_v50 = vmul.f32 %v1671_v26, %v1647_v18  ;;  %v1629_v13 = vadd.f32 %v4668_v42, %v4715_v1  ;;  %v1902_v60 = vmul.f32 %v1542_v4, %v1518_v59  ;;  %v4751_v42 = vld [vmem:[%s4998_s6 + $0x10] sm:$0xff]  ;;  %s3317_s6 = smov [#allocation3]  }
 0x1a6   :  { %v1926_v5 = vmul.f32 %v1560_v48, %v1536_v19  ;;  %v1904_v8 = vmul.f32 %v1655_v21, %v1631_v61  ;;  %v1901_v9 = vmul.f32 %v1540_v3, %v1516_v62  ;;  %s2642_s24 = sshll.u32 %s3317_s6, 4  ;;  %s2643_s24 = int_to_ptr.vmem [resolvable:$true] %s2642_s24 }
 0x1a7   :  { %v1928_v6 = vmul.f32 %v1673_v51, %v1649_v20  ;;  %v1903_v14 = vmul.f32 %v1653_v17, %v1629_v13  ;;  %s3292_s25 = scalar_lea.vmem %s2643_s24, 128  ;;  %p3297_p1 = scmp.lt.s32.totalorder %s2643_s24, %s2643_s24 }
 0x1a8   :  { %1997 = vmatprep.subr.mxu0 %v1926_v5  ;;  %p3293_p0 = scmp.ne.s32.totalorder %s2643_s24, %s3292_s25  ;;  %p3298_p2 = scmp.lt.s32.totalorder %s3292_s25, %s3292_s25 }
 0x1a9   :  { %2086 = vmatprep.subr.mxu1 %v1928_v6  ;;  %1998 = vmatpush1.msra.mxu0 %v1925_v53 }
 0x1aa   :  { %2087 = vmatpush1.msra.mxu1 %v1927_v50  ;;  %1999 = vmatprep.subr.mxu0 %v1918_v56  ;;  %p3299_p3 = por %p3298_p2, %p3297_p1 }
 0x1ab   :  { %2088 = vmatprep.subr.mxu1 %v1920_v57  ;;  %2000 = vmatpush1.msra.mxu0 %v1917_v10 }
 0x1ac   :  { %2089 = vmatpush1.msra.mxu1 %v1919_v11  ;;  %2001 = vmatprep.subr.mxu0 %v1910_v22  ;;  %p3300_p4 = pnand %p3299_p3, %p3293_p0 }
 0x1ad   :  { %2090 = vmatprep.subr.mxu1 %v1912_v0  ;;  %2002 = vmatpush1.msra.mxu0 %v1909_v15 }
 0x1ae   :  { %2091 = vmatpush1.msra.mxu1 %v1911_v16  ;;  %2003 = vmatprep.subr.mxu0 %v1902_v60 }
 0x1af   :  { %2092 = vmatprep.subr.mxu1 %v1904_v8  ;;  %2004 = vmatpush1.msra.mxu0 %v1901_v9 }
 0x1b0   :  { %2093 = vmatpush1.msra.mxu1 %v1903_v14  ;;  %2942 = vmatmul.mubr.msk.f32.vlgmr.msra.gmra.mxu0 %vm1040_vm1, %v4729_v43 }
 0x1b1   :  { %2946 = vmatmul.mubr.msk.f32.vlgmr.msra.gmra.mxu1 %vm1040_vm1, %v4729_v43  ;;  %2043 = vmatprep.mubr.f32.mxu0 %v3315_v27 }
 0x1b2   :  { %2132 = vmatprep.mubr.f32.mxu1 %v3315_v27 }
 0x1b4   :  { %2943 = vmatmul.mubr.msk.f32.gmra.mxu0 %vm1040_vm1, %v4740_v41 }
 0x1b5   :  { %2947 = vmatmul.mubr.msk.f32.gmra.mxu1 %vm1040_vm1, %v4740_v41  ;;  %2049 = vmatprep.mubr.f32.mxu0 %v3315_v27 }
 0x1b6   :  { %2138 = vmatprep.mubr.f32.mxu1 %v3315_v27 }
 0x1b8   :  { %2944 = vmatmul.mubr.msk.f32.gmra.mxu0 %vm1040_vm1, %v4751_v42 }
 0x1b9   :  { %2948 = vmatmul.mubr.msk.f32.gmra.mxu1 %vm1040_vm1, %v4751_v42  ;;  %2055 = vmatprep.mubr.f32.mxu0 %v3315_v27 }
 0x1ba   :  { %2144 = vmatprep.mubr.f32.mxu1 %v3315_v27 }
 0x1bc   :  { %2945 = vmatmul.mubr.msk.f32.gmra.mxu0 %vm1040_vm1, %v4762_v44 }
 0x1bd   :  { %2949 = vmatmul.mubr.msk.f32.gmra.mxu1 %vm1040_vm1, %v4762_v44  ;;  %2215 = vmatprep.mubr.f32.mxu0 %v3315_v27 }
 0x1be   :  { %2304 = vmatprep.mubr.f32.mxu1 %v3315_v27 }
 0x1c5   :  { %v1741_v18 = vpop.f32.mrf.mxu0 }
 0x1c6   :  { %v4770_v19 = vpop.f32.mrf.mxu1  ;;  %v1742_v11 = vadd.f32 %v1741_v18, %v4715_v1 }
 0x1c7   :  { %v1743_v20 = vpop.f32.mrf.mxu0 }
 0x1c8   :  { %v4772_v23 = vpop.f32.mrf.mxu1  ;;  %v1744_v21 = vadd.f32 %v1743_v20, %v4715_v1 }
 0x1c9   :  { %v1747_v24 = vpop.f32.mrf.mxu0 }
 0x1ca   :  { %v1860_v25 = vpop.f32.mrf.mxu1  ;;  %v1748_v22 = vadd.f32 %v1747_v24, %v4682_v7 }
 0x1cb   :  { %v1749_v26 = vpop.f32.mrf.mxu0  ;;  %v1861_v0 = vadd.f32 %v1860_v25, %v4682_v7 }
 0x1cc   :  { %v1862_v29 = vpop.f32.mrf.mxu1  ;;  %v1750_v17 = vadd.f32 %v1749_v26, %v4682_v7 }
 0x1cd   :  { %v1753_v30 = vpop.f32.mrf.mxu0  ;;  %v1863_v15 = vadd.f32 %v1862_v29, %v4682_v7 }
 0x1ce   :  { %v1866_v31 = vpop.f32.mrf.mxu1  ;;  %v1754_v16 = vadd.f32 %v1753_v30, %v4676_v58 }
 0x1cf   :  { %v1755_v32 = vpop.f32.mrf.mxu0  ;;  %v1867_v59 = vadd.f32 %v1866_v31, %v4676_v58 }
 0x1d0   :  { %v1868_v33 = vpop.f32.mrf.mxu1  ;;  %v1756_v13 = vadd.f32 %v1755_v32, %v4676_v58 }
 0x1d1   :  { %v1759_v45 = vpop.f32.mrf.mxu0  ;;  %v1869_v60 = vadd.f32 %v1868_v33, %v4676_v58 }
 0x1d2   :  { %v1872_v46 = vpop.f32.mrf.mxu1  ;;  %v1760_v8 = vadd.f32 %v1759_v45, %v4674_v55 }
 0x1d3   :  { %v1761_v47 = vpop.f32.mrf.mxu0  ;;  %v1873_v9 = vadd.f32 %v1872_v46, %v4674_v55 }
 0x1d4   :  { %v1874_v48 = vpop.f32.mrf.mxu1  ;;  %v1762_v14 = vadd.f32 %v1761_v47, %v4674_v55 }
 0x1d5   :  { %v1765_v51 = vpop.f32.mrf.mxu0  ;;  %v1875_v18 = vadd.f32 %v1874_v48, %v4674_v55 }
 0x1d6   :  { %v1878_v52 = vpop.f32.mrf.mxu1  ;;  %v1766_v31 = vadd.f32 %v1765_v51, %v4710_v54 }
 0x1d7   :  { %v1767_v49 = vpop.f32.mrf.mxu0 }
 0x1d8   :  { %v1880_v53 = vpop.f32.mrf.mxu1  ;;  %v1768_v32 = vadd.f32 %v1767_v49, %v4710_v54 }
 0x1d9   :  { %v1771_v50 = vpop.f32.mrf.mxu0  ;;  %v1881_v51 = vadd.f32 %v1880_v53, %v4710_v54 }
 0x1da   :  { %v1884_v56 = vpop.f32.mrf.mxu1 }
 0x1db   :  { %v1773_v57 = vpop.f32.mrf.mxu0 }
 0x1dc   :  { %v1886_v5 = vpop.f32.mrf.mxu1  ;;  %v1774_v45 = vadd.f32 %v1773_v57, %v4686_v12 }
 0x1dd   :  { %v1777_v6 = vpop.f32.mrf.mxu0  ;;  %v1887_v46 = vadd.f32 %v1886_v5, %v4686_v12  ;;  %v1857_v5 = vadd.f32 %v4772_v23, %v4715_v1 }
 0x1de   :  { %v1890_v3 = vpop.f32.mrf.mxu1  ;;  %v1778_v55 = vadd.f32 %v1777_v6, %v4680_v2 }
 0x1df   :  { %v1779_v4 = vpop.f32.mrf.mxu0  ;;  %v1891_v33 = vadd.f32 %v1890_v3, %v4680_v2  ;;  %v1916_v3 = vmul.f32 %v1887_v46, %v1863_v15 }
 0x1e0   :  { %v1892_v10 = vpop.f32.mrf.mxu1  ;;  %v1780_v26 = vadd.f32 %v1779_v4, %v4680_v2  ;;  %v1772_v4 = vadd.f32 %v1771_v50, %v4686_v12  ;;  %v1921_v6 = vmul.f32 %v1778_v55, %v1754_v16  ;;  %v1914_v50 = vmul.f32 %v1774_v45, %v1750_v17 }
 0x1e1   :  { %v1783_v61 = vpop.f32.mrf.mxu0  ;;  %v1893_v29 = vadd.f32 %v1892_v10, %v4680_v2  ;;  %v1885_v10 = vadd.f32 %v1884_v56, %v4686_v12  ;;  %v1879_v2 = vadd.f32 %v1878_v52, %v4710_v54  ;;  %v1923_v57 = vmul.f32 %v1891_v33, %v1867_v59 }
 0x1e2   :  { %v1896_v62 = vpop.f32.mrf.mxu1  ;;  %v1784_v7 = vadd.f32 %v1783_v61, %v4678_v63  ;;  %v1855_v12 = vadd.f32 %v4770_v19, %v4715_v1  ;;  %v1913_v53 = vmul.f32 %v1772_v4, %v1748_v22  ;;  %v1908_v54 = vmul.f32 %v1881_v51, %v1857_v5  ;;  %v4830_v1 = vpop.permute.xlu0 %1943 }
 0x1e3   :  { %v1897_v20 = vadd.f32 %v1896_v62, %v4678_v63  ;;  %v1785_v24 = vpop.f32.mrf.mxu0  ;;  %v1922_v62 = vmul.f32 %v1780_v26, %v1756_v13  ;;  %v1924_v49 = vmul.f32 %v1893_v29, %v1869_v60  ;;  %v1915_v56 = vmul.f32 %v1885_v10, %v1861_v0 }
 0x1e4   :  { %v1898_v25 = vpop.f32.mrf.mxu1  ;;  %v1786_v58 = vadd.f32 %v1785_v24, %v4678_v63  ;;  %v1929_v61 = vmul.f32 %v1784_v7, %v1760_v8  ;;  %v1906_v13 = vmul.f32 %v1768_v32, %v1744_v21  ;;  %v1905_v52 = vmul.f32 %v1766_v31, %v1742_v11 }
 0x1e5   :  { %v1899_v30 = vadd.f32 %v1898_v25, %v4678_v63  ;;  %v1931_v63 = vmul.f32 %v1897_v20, %v1873_v9  ;;  %v1907_v16 = vmul.f32 %v1879_v2, %v1855_v12 }
 0x1e6   :  { %v1930_v47 = vmul.f32 %v1786_v58, %v1762_v14 }
 0x1e7   :  { %v1932_v48 = vmul.f32 %v1899_v30, %v1875_v18 }
 0x1e8   :  { %2175 = vmatprep.subr.mxu0 %v1930_v47 }
 0x1e9   :  { %2264 = vmatprep.subr.mxu1 %v1932_v48  ;;  %2176 = vmatpush1.msra.mxu0 %v1929_v61 }
 0x1ea   :  { %2265 = vmatpush1.msra.mxu1 %v1931_v63  ;;  %2177 = vmatprep.subr.mxu0 %v1922_v62 }
 0x1eb   :  { %2266 = vmatprep.subr.mxu1 %v1924_v49  ;;  %2178 = vmatpush1.msra.mxu0 %v1921_v6 }
 0x1ec   :  { %2267 = vmatpush1.msra.mxu1 %v1923_v57  ;;  %2179 = vmatprep.subr.mxu0 %v1914_v50 }
 0x1ed   :  { %2268 = vmatprep.subr.mxu1 %v1916_v3  ;;  %2180 = vmatpush1.msra.mxu0 %v1913_v53 }
 0x1ee   :  { %2269 = vmatpush1.msra.mxu1 %v1915_v56  ;;  %2181 = vmatprep.subr.mxu0 %v1906_v13 }
 0x1ef   :  { %2270 = vmatprep.subr.mxu1 %v1908_v54  ;;  %2182 = vmatpush1.msra.mxu0 %v1905_v52 }
 0x1f0   :  { %2271 = vmatpush1.msra.mxu1 %v1907_v16  ;;  %2950 = vmatmul.mubr.msk.f32.vlgmr.msra.gmra.mxu0 %vm1040_vm1, %v4729_v43 }
 0x1f1   :  { %2954 = vmatmul.mubr.msk.f32.vlgmr.msra.gmra.mxu1 %vm1040_vm1, %v4729_v43  ;;  %2221 = vmatprep.mubr.f32.mxu0 %v3315_v27  ;;  %v4832_v43 = vpop.permute.xlu1 %1948 }
 0x1f2   :  { %2310 = vmatprep.mubr.f32.mxu1 %v3315_v27 }
 0x1f4   :  { %2951 = vmatmul.mubr.msk.f32.gmra.mxu0 %vm1040_vm1, %v4740_v41 }
 0x1f5   :  { %2955 = vmatmul.mubr.msk.f32.gmra.mxu1 %vm1040_vm1, %v4740_v41  ;;  %2227 = vmatprep.mubr.f32.mxu0 %v3315_v27  ;;  %v4834_v41 = vpop.permute.xlu0 %1953  ;;  %v4836_v19 = vpop.permute.xlu1 %1958 }
 0x1f6   :  { %2316 = vmatprep.mubr.f32.mxu1 %v3315_v27 }
 0x1f8   :  { %2952 = vmatmul.mubr.msk.f32.gmra.mxu0 %vm1040_vm1, %v4751_v42 }
 0x1f9   :  { %2956 = vmatmul.mubr.msk.f32.gmra.mxu1 %vm1040_vm1, %v4751_v42  ;;  %2233 = vmatprep.mubr.f32.mxu0 %v3315_v27  ;;  %v4838_v23 = vpop.permute.xlu0 %2429  ;;  %v4840_v42 = vpop.permute.xlu1 %2434 }
 0x1fa   :  { %2322 = vmatprep.mubr.f32.mxu1 %v3315_v27 }
 0x1fc   :  { %2953 = vmatmul.mubr.msk.f32.gmra.mxu0 %vm1040_vm1, %v4762_v44 }
 0x1fd   :  { %2957 = vmatmul.mubr.msk.f32.gmra.mxu1 %vm1040_vm1, %v4762_v44  ;;  %v4842_v11 = vpop.permute.xlu0 %173  ;;  %v4844_v27 = vpop.permute.xlu1 %2439 }
 0x1fe   :  { %v631_v21 = vadd.f32 %v4650_v28, %v4842_v11  ;;  %v702_v44 = vadd.f32 %v4652_v34, %v4842_v11  ;;  %v633_v22 = vadd.f32 %v4654_v35, %v4842_v11  ;;  %v704_v17 = vadd.f32 %v4656_v36, %v4842_v11 }
 0x200   :  { %v848_v0 = vmax.f32 %v631_v21, 0.0  ;;  %v850_v59 = vmax.f32 %v702_v44, 0.0  ;;  %v849_v60 = vmax.f32 %v633_v22, 0.0  ;;  %v851_v8 = vmax.f32 %v704_v17, 0.0 }
 0x201   :  { %v4854_v15 = vpop.permute.xlu1 %2364 }
 0x202   :  { %v2367_v9 = vmul.f32 %v4854_v15, %v848_v0  ;;  %v2368_v14 = vmul.f32 %v4854_v15, %v849_v60  ;;  %v2369_v28 = vmul.f32 %v4854_v15, %v850_v59  ;;  %v2370_v7 = vmul.f32 %v4854_v15, %v851_v8 }
 0x204   :  { %v2375_v35 = vrot.slane %v2367_v9, 4  ;;  %v2381_v26 = vrot.slane %v2368_v14, 4  ;;  %v2387_v29 = vrot.slane %v2369_v28, 4  ;;  %v2393_v33 = vrot.slane %v2370_v7, 4 }
 0x206   :  { %v4864_v55 = vadd.f32 %v2375_v35, %v2367_v9  ;;  %v4868_v61 = vadd.f32 %v2381_v26, %v2368_v14  ;;  %v4870_v63 = vadd.f32 %v2387_v29, %v2369_v28  ;;  %v4876_v13 = vadd.f32 %v2393_v33, %v2370_v7 }
 0x208   :  { %v2377_v44 = vrot.slane %v4864_v55, 2 }
 0x270   :  { %v2039_v18 = vpop.f32.mrf.mxu0 }
 0x271   :  { %v2128_v34 = vpop.f32.mrf.mxu1  ;;  %v2040_v20 = vadd.f32 %v2039_v18, %v4830_v1 }
 0x272   :  { %v2129_v36 = vadd.f32 %v2128_v34, %v4830_v1  ;;  %v2041_v24 = vpop.f32.mrf.mxu0 }
 0x273   :  { %v2130_v25 = vpop.f32.mrf.mxu1  ;;  %v2042_v58 = vadd.f32 %v2041_v24, %v4830_v1  ;;  %v2329_v45 = vmax.f32 %v2040_v20, 0.0 }
 0x274   :  { %v2131_v30 = vadd.f32 %v2130_v25, %v4830_v1  ;;  %v2045_v31 = vpop.f32.mrf.mxu0  ;;  %v2331_v46 = vmax.f32 %v2129_v36, 0.0 }
 0x275   :  { %v2134_v32 = vpop.f32.mrf.mxu1  ;;  %v2046_v47 = vadd.f32 %v2045_v31, %v4832_v43  ;;  %v2330_v49 = vmax.f32 %v2042_v58, 0.0  ;;  %v2447_v54 = vmul.f32 %v4838_v23, %v2329_v45 }
 0x276   :  { %v2135_v48 = vadd.f32 %v2134_v32, %v4832_v43  ;;  %v2047_v4 = vpop.f32.mrf.mxu0  ;;  %v2332_v2 = vmax.f32 %v2131_v30, 0.0  ;;  %v2449_v52 = vmul.f32 %v4838_v23, %v2331_v46 }
 0x277   :  { %v2136_v10 = vpop.f32.mrf.mxu1  ;;  %v2048_v51 = vadd.f32 %v2047_v4, %v4832_v43  ;;  %v2337_v6 = vmax.f32 %v2046_v47, 0.0  ;;  %v2448_v60 = vmul.f32 %v4838_v23, %v2330_v49  ;;  %v4897_v4 = vpop.permute.xlu0 %2444 }
 0x278   :  { %v2137_v62 = vadd.f32 %v2136_v10, %v4832_v43  ;;  %v2339_v57 = vmax.f32 %v2135_v48, 0.0  ;;  %v2051_v5 = vpop.f32.mrf.mxu0  ;;  %v2450_v8 = vmul.f32 %v4838_v23, %v2332_v2 }
 0x279   :  { %v2140_v50 = vpop.f32.mrf.mxu1  ;;  %v2338_v3 = vmax.f32 %v2048_v51, 0.0  ;;  %v2052_v53 = vadd.f32 %v2051_v5, %v4834_v41  ;;  %v2455_v22 = vmul.f32 %v4840_v42, %v2337_v6 }
 0x27a   :  { %v2340_v12 = vmax.f32 %v2137_v62, 0.0  ;;  %v2141_v56 = vadd.f32 %v2140_v50, %v4834_v41  ;;  %v2053_v16 = vpop.f32.mrf.mxu0  ;;  %v2457_v0 = vmul.f32 %v4840_v42, %v2339_v57 }
 0x27b   :  { %v2142_v21 = vpop.f32.mrf.mxu1  ;;  %v2345_v17 = vmax.f32 %v2052_v53, 0.0  ;;  %v2054_v9 = vadd.f32 %v2053_v16, %v4834_v41  ;;  %v2456_v34 = vmul.f32 %v4840_v42, %v2338_v3  ;;  %v2479_v30 = vadd.f32 %v2455_v22, %v2447_v54 }
 0x27c   :  { %v2347_v59 = vmax.f32 %v2141_v56, 0.0  ;;  %v2143_v14 = vadd.f32 %v2142_v21, %v4834_v41  ;;  %v2057_v28 = vpop.f32.mrf.mxu0  ;;  %v2458_v7 = vmul.f32 %v4840_v42, %v2340_v12  ;;  %v2497_v31 = vadd.f32 %v2457_v0, %v2449_v52 }
 0x27d   :  { %v2146_v18 = vpop.f32.mrf.mxu1  ;;  %v2463_v35 = vmul.f32 %v4844_v27, %v2345_v17  ;;  %v2346_v36 = vmax.f32 %v2054_v9, 0.0  ;;  %v2058_v25 = vadd.f32 %v2057_v28, %v4836_v19  ;;  %v2488_v10 = vadd.f32 %v2456_v34, %v2448_v60 }
 0x27e   :  { %v2465_v20 = vmul.f32 %v4844_v27, %v2347_v59  ;;  %v2348_v24 = vmax.f32 %v2143_v14, 0.0  ;;  %v2147_v26 = vadd.f32 %v2146_v18, %v4836_v19  ;;  %v2059_v29 = vpop.f32.mrf.mxu0  ;;  %v2506_v51 = vadd.f32 %v2458_v7, %v2450_v8 }
 0x27f   :  { %v2148_v58 = vpop.f32.mrf.mxu1  ;;  %v2060_v32 = vadd.f32 %v2059_v29, %v4836_v19  ;;  %v2464_v45 = vmul.f32 %v4844_v27, %v2346_v36  ;;  %v2353_v47 = vmax.f32 %v2058_v25, 0.0  ;;  %v2480_v2 = vadd.f32 %v2479_v30, %v2463_v35 }
 0x280   :  { %v2149_v33 = vadd.f32 %v2148_v58, %v4836_v19  ;;  %v2466_v46 = vmul.f32 %v4844_v27, %v2348_v24  ;;  %v2355_v48 = vmax.f32 %v2147_v26, 0.0  ;;  %v2498_v6 = vadd.f32 %v2497_v31, %v2465_v20 }
 0x281   :  { %v2354_v62 = vmax.f32 %v2060_v32, 0.0  ;;  %v2471_v57 = vmul.f32 %v4897_v4, %v2353_v47  ;;  %v2489_v50 = vadd.f32 %v2488_v10, %v2464_v45  ;;  %v2389_v54 = vrot.slane %v4870_v63, 2 }
 0x282   :  { %v2356_v49 = vmax.f32 %v2149_v33, 0.0  ;;  %v2473_v5 = vmul.f32 %v4897_v4, %v2355_v48  ;;  %v2507_v3 = vadd.f32 %v2506_v51, %v2466_v46  ;;  %v2383_v16 = vrot.slane %v4868_v61, 2 }
 0x283   :  { %v2472_v12 = vmul.f32 %v4897_v4, %v2354_v62  ;;  %v2481_v56 = vadd.f32 %v2480_v2, %v2471_v57  ;;  %v2395_v22 = vrot.slane %v4876_v13, 2  ;;  %v2565_v60 = vlaneseq  ;;  %v2563_v2 = vpop.permute.xlu0 %2562 }
 0x284   :  { %v2474_v53 = vmul.f32 %v4897_v4, %v2356_v49  ;;  %v2499_v52 = vadd.f32 %v2498_v6, %v2473_v5  ;;  %v2378_v8 = vadd.f32 %v2377_v44, %v4864_v55  ;;  %v2390_v18 = vadd.f32 %v2389_v54, %v4870_v63 }
 0x285   :  { %v2490_v21 = vadd.f32 %v2489_v50, %v2472_v12  ;;  %v2482_v17 = vrot.slane %v2481_v56, 4  ;;  %v2384_v7 = vadd.f32 %v2383_v16, %v4868_v61  ;;  %v2396_v20 = vadd.f32 %v2395_v22, %v4876_v13 }
 0x286   :  { %v2508_v0 = vadd.f32 %v2507_v3, %v2474_v53  ;;  %v2500_v59 = vrot.slane %v2499_v52, 4  ;;  %v2566_v26 = vshrl.u32 %v2565_v60, 7  ;;  %v2379_v29 = vrot.slane %v2378_v8, 1 }
 0x287   :  { %v2491_v9 = vrot.slane %v2490_v21, 4  ;;  %v2483_v28 = vadd.f32 %v2482_v17, %v2481_v56  ;;  %v3316_v31 = vmov 1966171168   ;;  %v2391_v32 = vrot.slane %v2390_v18, 1 }
 0x288   :  { %v2509_v14 = vrot.slane %v2508_v0, 4  ;;  %v2501_v34 = vadd.f32 %v2500_v59, %v2499_v52  ;;  %v2590_v55 = vunpack.c.l.s4 %v3316_v31  ;;  %v2385_v45 = vrot.slane %v2384_v7, 1 }
 0x289   :  { %v2492_v35 = vadd.f32 %v2491_v9, %v2490_v21  ;;  %v2484_v24 = vrot.slane %v2483_v28, 2  ;;  %v2397_v46 = vrot.slane %v2396_v20, 1  ;;  %v2567_v10 = vsub.s32 0, %v2566_v26 }
 0x28a   :  { %v2510_v36 = vadd.f32 %v2509_v14, %v2508_v0  ;;  %v2502_v25 = vrot.slane %v2501_v34, 2  ;;  %v2380_v13 = vadd.f32 %v2379_v29, %v2378_v8  ;;  %v2591_v49 = vunpack.c.0.s8 %v2590_v55 }
 0x28b   :  { %v2493_v58 = vrot.slane %v2492_v35, 2  ;;  %v2485_v44 = vadd.f32 %v2484_v24, %v2483_v28  ;;  %v2392_v57 = vadd.f32 %v2391_v32, %v2390_v18  ;;  %v2386_v50 = vadd.f32 %v2385_v45, %v2384_v7 }
 0x28c   :  { %v2511_v30 = vrot.slane %v2510_v36, 2  ;;  %v2503_v33 = vadd.f32 %v2502_v25, %v2501_v34  ;;  %v2398_v12 = vadd.f32 %v2397_v46, %v2396_v20  ;;  %v4910_v52 = vrot.slane %v2563_v2, %v2567_v10 }
 0x28d   :  { %v2494_v63 = vadd.f32 %v2493_v58, %v2492_v35  ;;  %v2486_v61 = vrot.slane %v2485_v44, 1  ;;  %v4912_v22 = vsub.s32 %v2591_v49, %v2566_v26  ;;  %v773_v34 = vadd.f32 %v4658_v37, %v4842_v11 }
 0x28e   :  { %v2512_v47 = vadd.f32 %v2511_v30, %v2510_v36  ;;  %v2504_v48 = vrot.slane %v2503_v33, 1  ;;  %v844_v7 = vadd.f32 %v4660_v38, %v4842_v11  ;;  %v775_v35 = vadd.f32 %v4662_v39, %v4842_v11 }
 0x28f   :  { %v2495_v51 = vrot.slane %v2494_v63, 1  ;;  %v2487_v6 = vadd.f32 %v2486_v61, %v2485_v44  ;;  %v846_v20 = vadd.f32 %v4664_v40, %v4842_v11  ;;  %v852_v36 = vmax.f32 %v773_v34, 0.0 }
 0x290   :  { %v2513_v62 = vrot.slane %v2512_v47, 1  ;;  %v2505_v5 = vadd.f32 %v2504_v48, %v2503_v33  ;;  %v854_v24 = vmax.f32 %v844_v7, 0.0  ;;  %v853_v25 = vmax.f32 %v775_v35, 0.0 }
 0x291   :  { %v2496_v3 = vadd.f32 %v2495_v51, %v2494_v63  ;;  %v2551_v56 = vadd.f32 %v2487_v6, %v2380_v13  ;;  %v855_v26 = vmax.f32 %v846_v20, 0.0  ;;  %v2371_v29 = vmul.f32 %v4854_v15, %v852_v36 }
 0x292   :  { %v2514_v53 = vadd.f32 %v2513_v62, %v2512_v47  ;;  %v2553_v54 = vadd.f32 %v2505_v5, %v2392_v57  ;;  %v2373_v58 = vmul.f32 %v4854_v15, %v854_v24  ;;  %v2372_v37 = vmul.f32 %v4854_v15, %v853_v25 }
 0x293   :  { %v2552_v16 = vadd.f32 %v2496_v3, %v2386_v50  ;;  %v2569_v0 = vadd.f32 %v4910_v52, %v2551_v56  ;;  %v2374_v38 = vmul.f32 %v4854_v15, %v855_v26  ;;  %v2399_v11 = vrot.slane %v2371_v29, 4 }
 0x294   :  { %v2554_v21 = vadd.f32 %v2514_v53, %v2398_v12  ;;  %v2571_v59 = vadd.f32 %v4910_v52, %v2553_v54  ;;  %v2411_v32 = vrot.slane %v2373_v58, 4  ;;  %v2405_v47 = vrot.slane %v2372_v37, 4 }
 0x295   :  { %v2570_v17 = vadd.f32 %v4910_v52, %v2552_v16  ;;  %v2417_v61 = vrot.slane %v2374_v38, 4  ;;  %v4944_v49 = vadd.f32 %v2399_v11, %v2371_v29 }
 0x296   :  { %v2572_v60 = vadd.f32 %v4910_v52, %v2554_v21  ;;  %v4946_v2 = vadd.f32 %v2411_v32, %v2373_v58 }
 0x297   :  { %v2585_v8 = vcombine.low %v2569_v0, %v2570_v17  ;;  %v2406_v0 = vadd.f32 %v2405_v47, %v2372_v37  ;;  %v2418_v17 = vadd.f32 %v2417_v61, %v2374_v38 }
 0x298   :  { %v2586_v9 = vcombine.low %v2571_v59, %v2572_v60 }
 0x299   :  { %v4919_v14 = vrot.slane %v2585_v8, %v4912_v22 }
 0x29a   :  { %v4922_v28 = vrot.slane %v2586_v9, %v4912_v22 }
 0x29c   :  { %v2617_v18 = vcombine.low %v4919_v14, %v4922_v28 }
 0x2b0   :  { %v2217_v30 = vpop.f32.mrf.mxu0 }
 0x2b1   :  { %v2306_v31 = vpop.f32.mrf.mxu1  ;;  %v2218_v55 = vadd.f32 %v2217_v30, %v4830_v1 }
 0x2b2   :  { %v2307_v39 = vadd.f32 %v2306_v31, %v4830_v1  ;;  %v2219_v44 = vpop.f32.mrf.mxu0 }
 0x2b3   :  { %v2308_v40 = vpop.f32.mrf.mxu1  ;;  %v2220_v33 = vadd.f32 %v2219_v44, %v4830_v1  ;;  %v2333_v48 = vmax.f32 %v2218_v55, 0.0 }
 0x2b4   :  { %v2309_v45 = vadd.f32 %v2308_v40, %v4830_v1  ;;  %v2223_v63 = vpop.f32.mrf.mxu0  ;;  %v2335_v10 = vmax.f32 %v2307_v39, 0.0 }
 0x2b5   :  { %v2312_v46 = vpop.f32.mrf.mxu1  ;;  %v2224_v15 = vadd.f32 %v2223_v63, %v4832_v43  ;;  %v2334_v57 = vmax.f32 %v2220_v33, 0.0  ;;  %v2451_v59 = vmul.f32 %v4838_v23, %v2333_v48 }
 0x2b6   :  { %v2313_v13 = vadd.f32 %v2312_v46, %v4832_v43  ;;  %v2225_v51 = vpop.f32.mrf.mxu0  ;;  %v2336_v5 = vmax.f32 %v2309_v45, 0.0  ;;  %v2453_v60 = vmul.f32 %v4838_v23, %v2335_v10 }
 0x2b7   :  { %v2314_v62 = vpop.f32.mrf.mxu1  ;;  %v2226_v6 = vadd.f32 %v2225_v51, %v4832_v43  ;;  %v2341_v50 = vmax.f32 %v2224_v15, 0.0  ;;  %v2452_v20 = vmul.f32 %v4838_v23, %v2334_v57 }
 0x2b8   :  { %v2315_v1 = vadd.f32 %v2314_v62, %v4832_v43  ;;  %v2343_v3 = vmax.f32 %v2313_v13, 0.0  ;;  %v2229_v12 = vpop.f32.mrf.mxu0  ;;  %v2454_v36 = vmul.f32 %v4838_v23, %v2336_v5  ;;  %v2413_v5 = vrot.slane %v4946_v2, 2 }
 0x2b9   :  { %v2318_v53 = vpop.f32.mrf.mxu1  ;;  %v2342_v56 = vmax.f32 %v2226_v6, 0.0  ;;  %v2230_v16 = vadd.f32 %v2229_v12, %v4834_v41  ;;  %v2459_v9 = vmul.f32 %v4840_v42, %v2341_v50  ;;  %v2407_v12 = vrot.slane %v2406_v0, 2 }
 0x2ba   :  { %v2344_v54 = vmax.f32 %v2315_v1, 0.0  ;;  %v2319_v21 = vadd.f32 %v2318_v53, %v4834_v41  ;;  %v2231_v8 = vpop.f32.mrf.mxu0  ;;  %v2461_v34 = vmul.f32 %v4840_v42, %v2343_v3  ;;  %v2419_v53 = vrot.slane %v2418_v17, 2 }
 0x2bb   :  { %v2320_v43 = vpop.f32.mrf.mxu1  ;;  %v2349_v7 = vmax.f32 %v2230_v16, 0.0  ;;  %v2232_v24 = vadd.f32 %v2231_v8, %v4834_v41  ;;  %v2460_v58 = vmul.f32 %v4840_v42, %v2342_v56  ;;  %v2515_v11 = vadd.f32 %v2459_v9, %v2451_v59 }
 0x2bc   :  { %v2351_v35 = vmax.f32 %v2319_v21, 0.0  ;;  %v2321_v25 = vadd.f32 %v2320_v43, %v4834_v41  ;;  %v2235_v26 = vpop.f32.mrf.mxu0  ;;  %v2462_v30 = vmul.f32 %v4840_v42, %v2344_v54  ;;  %v2533_v41 = vadd.f32 %v2461_v34, %v2453_v60 }
 0x2bd   :  { %v2324_v29 = vpop.f32.mrf.mxu1  ;;  %v2467_v31 = vmul.f32 %v4844_v27, %v2349_v7  ;;  %v2350_v38 = vmax.f32 %v2232_v24, 0.0  ;;  %v2236_v39 = vadd.f32 %v2235_v26, %v4836_v19  ;;  %v2524_v47 = vadd.f32 %v2460_v58, %v2452_v20 }
 0x2be   :  { %v2469_v37 = vmul.f32 %v4844_v27, %v2351_v35  ;;  %v2352_v55 = vmax.f32 %v2321_v25, 0.0  ;;  %v2325_v23 = vadd.f32 %v2324_v29, %v4836_v19  ;;  %v2237_v44 = vpop.f32.mrf.mxu0  ;;  %v2542_v61 = vadd.f32 %v2462_v30, %v2454_v36 }
 0x2bf   :  { %v2326_v40 = vpop.f32.mrf.mxu1  ;;  %v2238_v32 = vadd.f32 %v2237_v44, %v4836_v19  ;;  %v2468_v42 = vmul.f32 %v4844_v27, %v2350_v38  ;;  %v2357_v63 = vmax.f32 %v2236_v39, 0.0  ;;  %v2516_v15 = vadd.f32 %v2515_v11, %v2467_v31 }
 0x2c0   :  { %v2327_v33 = vadd.f32 %v2326_v40, %v4836_v19  ;;  %v2470_v45 = vmul.f32 %v4844_v27, %v2352_v55  ;;  %v2359_v46 = vmax.f32 %v2325_v23, 0.0  ;;  %v2534_v13 = vadd.f32 %v2533_v41, %v2469_v37 }
 0x2c1   :  { %v2358_v48 = vmax.f32 %v2238_v32, 0.0  ;;  %v2475_v51 = vmul.f32 %v4897_v4, %v2357_v63  ;;  %v2525_v6 = vadd.f32 %v2524_v47, %v2468_v42  ;;  %v2401_v27 = vrot.slane %v4944_v49, 2 }
 0x2c2   :  { %v2360_v10 = vmax.f32 %v2327_v33, 0.0  ;;  %v2477_v62 = vmul.f32 %v4897_v4, %v2359_v46  ;;  %v2543_v1 = vadd.f32 %v2542_v61, %v2470_v45  ;;  %v2414_v43 = vadd.f32 %v2413_v5, %v4946_v2 }
 0x2c3   :  { %v2476_v19 = vmul.f32 %v4897_v4, %v2358_v48  ;;  %v2517_v50 = vadd.f32 %v2516_v15, %v2475_v51  ;;  %v2402_v8 = vadd.f32 %v2401_v27, %v4944_v49  ;;  %v2408_v34 = vadd.f32 %v2407_v12, %v2406_v0 }
 0x2c4   :  { %v2478_v57 = vmul.f32 %v4897_v4, %v2360_v10  ;;  %v2535_v3 = vadd.f32 %v2534_v13, %v2477_v62  ;;  %v2420_v7 = vadd.f32 %v2419_v53, %v2418_v17  ;;  %v2415_v58 = vrot.slane %v2414_v43, 1 }
 0x2c5   :  { %v2526_v56 = vadd.f32 %v2525_v6, %v2476_v19  ;;  %v2518_v16 = vrot.slane %v2517_v50, 4  ;;  %v2403_v29 = vrot.slane %v2402_v8, 1  ;;  %v2409_v37 = vrot.slane %v2408_v34, 1 }
 0x2c6   :  { %v2544_v54 = vadd.f32 %v2543_v1, %v2478_v57  ;;  %v2536_v21 = vrot.slane %v2535_v3, 4  ;;  %v2421_v38 = vrot.slane %v2420_v7, 1  ;;  %v2416_v17 = vadd.f32 %v2415_v58, %v2414_v43 }
 0x2c7   :  { %v2527_v59 = vrot.slane %v2526_v56, 4  ;;  %v2519_v9 = vadd.f32 %v2518_v16, %v2517_v50  ;;  %v2404_v0 = vadd.f32 %v2403_v29, %v2402_v8  ;;  %v2410_v41 = vadd.f32 %v2409_v37, %v2408_v34 }
 0x2c8   :  { %v2545_v60 = vrot.slane %v2544_v54, 4  ;;  %v2537_v4 = vadd.f32 %v2536_v21, %v2535_v3  ;;  %v2422_v32 = vadd.f32 %v2421_v38, %v2420_v7  ;;  %v2625_v19 = vrot.slane %v2617_v18, %v4912_v22 }
 0x2c9   :  { %v2528_v35 = vadd.f32 %v2527_v59, %v2526_v56  ;;  %v2520_v36 = vrot.slane %v2519_v9, 2 }
 0x2ca   :  { %v2546_v20 = vadd.f32 %v2545_v60, %v2544_v54  ;;  %v2538_v24 = vrot.slane %v2537_v4, 2 }
 0x2cb   :  { %v2529_v25 = vrot.slane %v2528_v35, 2  ;;  %v2521_v30 = vadd.f32 %v2520_v36, %v2519_v9 }
 0x2cc   :  { %v2547_v26 = vrot.slane %v2546_v20, 2  ;;  %v2539_v31 = vadd.f32 %v2538_v24, %v2537_v4 }
 0x2cd   :  { %v2530_v55 = vadd.f32 %v2529_v25, %v2528_v35  ;;  %v2522_v39 = vrot.slane %v2521_v30, 1 }
 0x2ce   :  { %v2548_v49 = vadd.f32 %v2547_v26, %v2546_v20  ;;  %v2540_v2 = vrot.slane %v2539_v31, 1 }
 0x2cf   :  { %v2531_v23 = vrot.slane %v2530_v55, 1  ;;  %v2523_v40 = vadd.f32 %v2522_v39, %v2521_v30 }
 0x2d0   :  { %v2549_v44 = vrot.slane %v2548_v49, 1  ;;  %v2541_v11 = vadd.f32 %v2540_v2, %v2539_v31 }
 0x2d1   :  { %v2532_v33 = vadd.f32 %v2531_v23, %v2530_v55  ;;  %v2555_v45 = vadd.f32 %v2523_v40, %v2404_v0 }
 0x2d2   :  { %v2550_v42 = vadd.f32 %v2549_v44, %v2548_v49  ;;  %v2557_v63 = vadd.f32 %v2541_v11, %v2416_v17 }
 0x2d3   :  { %v2556_v46 = vadd.f32 %v2532_v33, %v2410_v41  ;;  %v2573_v61 = vadd.f32 %v4910_v52, %v2555_v45 }
 0x2d4   :  { %v2558_v47 = vadd.f32 %v2550_v42, %v2422_v32  ;;  %v2575_v10 = vadd.f32 %v4910_v52, %v2557_v63 }
 0x2d5   :  { %v2574_v48 = vadd.f32 %v4910_v52, %v2556_v46 }
 0x2d6   :  { %v2576_v15 = vadd.f32 %v4910_v52, %v2558_v47 }
 0x2d7   :  { %v2587_v13 = vcombine.low %v2573_v61, %v2574_v48 }
 0x2d8   :  { %v2588_v51 = vcombine.low %v2575_v10, %v2576_v15 }
 0x2d9   :  { %v2609_v62 = vrot.slane %v2587_v13, %v4912_v22 }
 0x2da   :  { %v2616_v6 = vrot.slane %v2588_v51, %v4912_v22 }
 0x2dc   :  { %v2618_v1 = vcombine.low %v2609_v62, %v2616_v6 }
 0x2de   :  { %v2632_v57 = vrot.slane %v2618_v1, %v4912_v22 }
 0x2e0   :  { %v2633_v27 = vcombine.low %v2625_v19, %v2632_v57 }
 0x2e2   :  { %2635 = vst [vmem:[#allocation3] sm:$0xff] %v2633_v27 }
 0x2e3   :  { %3303 = shalt.err (!%p3300_p4)
}
 0x2e4   :  { %2645 = dma.vmem_to_hbm [thread:$0]  %s2643_s24, 128, %s5003_s11, [#allocation4]  }
 0x2e5   :  { %3312 = dma.done.wait [#allocation4], 128  }
 0x2e6   :  { %3313 = vsyncadd [#allocation4], 4294967168 }
 0x2e7   :  { %2649 = vsyncpa [#allocation4], 1 }

</bundles_post_ra>
